<compile_context>
chip_gen: v7x
topology: tpu7x:2x2x1
jax: 0.10.0
libtpu: 0.0.40
codegen_flags: <defaults>
</compile_context>

<pallas_src>
import functools

import numpy as np
import jax
import jax.numpy as jnp
from jax.experimental import pallas as pl
from jax.experimental.pallas import tpu as pltpu


def _leaky_relu(x, slope=0.2):
    return jnp.where(x >= 0, x, slope * x)


def _round_up(x, m):
    return (x + m - 1) // m * m


def _next_pow2(x):
    return 1 << (int(x) - 1).bit_length()


def _packing(d, hc):
    """Slot width S and packing factor P (P feature-slots of width S per 128-lane row)."""
    s0 = max(d, hc)
    if s0 <= 128:
        s = _next_pow2(s0)
        p = 128 // s
    else:
        s = _round_up(s0, 128)
        p = 1
    return p, s


# --------------------------------------------------------------------------- #
# Pallas kernel: per node-group tile, run the full multi-layer GATv2 metapath
# aggregation (relu -> L-1 full GATv2 layers -> final GATv2 layer restricted to
# edges whose destination is the self-relation node).  All activations live in
# the packed [relation, node_group, 128] layout.
# --------------------------------------------------------------------------- #
def _metapath_gat_kernel(x_ref, wf_ref, bf_ref, attA_ref, bias_ref,
                         hout_ref, beta_ref,
                         *, n_layers, n_rel, compute_dtype):
    R = n_rel
    _, TM, LW = x_ref.shape                     # [R, tile_m, packed lane width]

    h = jnp.maximum(x_ref[...].astype(jnp.float32), 0.0)            # [R, TM, LW]

    for l in range(n_layers):
        wf = wf_ref[l]                           # [LW, 2*LW]  (compute_dtype, block-diag packed)
        bf = bf_ref[l]                           # [1, 2*LW]   f32
        attA = attA_ref[l]                       # [LW, LW]    (compute_dtype, head-replicated)
        bias = bias_ref[l]                       # [1, LW]     f32

        hc = h.reshape(R * TM, LW).astype(compute_dtype)
        # Fused source/target transform: one [R*TM, LW] x [LW, 2*LW] matmul.
        xlr = jnp.dot(hc, wf, preferred_element_type=jnp.float32) + bf
        xl = xlr[:, :LW].reshape(R, TM, LW)      # source transform   (lin_l)
        xr = xlr[:, LW:].reshape(R, TM, LW)      # destination transform (lin_r)

        if l + 1 < n_layers:
            # All (src, dst) pairs; src axis leading so every softmax reduce is an
            # elementwise combine of R dense [R, TM, LW] slabs (pure VPU, no XLU).
            s = _leaky_relu(xl[:, None] + xr[None, :])               # [Rsrc, Rdst, TM, LW]
            logits = jnp.dot(
                s.reshape(R * R * TM, LW).astype(compute_dtype), attA,
                preferred_element_type=jnp.float32).reshape(R, R, TM, LW)
            mx = jnp.max(logits, axis=0, keepdims=True)
            p = jnp.exp(logits - mx)
            inv = pl.reciprocal(jnp.sum(p, axis=0), approx=True)     # [Rdst, TM, LW]
            out = jnp.sum(p * xl[:, None], axis=0) * inv             # [Rdst, TM, LW]
            h = jnp.maximum(out + bias, 0.0)                         # next layer input
        else:
            # Last layer: only edges whose destination is the self relation (last index).
            s = _leaky_relu(xl + xr[R - 1][None])                    # [Rsrc, TM, LW]
            logits = jnp.dot(
                s.reshape(R * TM, LW).astype(compute_dtype), attA,
                preferred_element_type=jnp.float32).reshape(R, TM, LW)
            mx = jnp.max(logits, axis=0, keepdims=True)
            p = jnp.exp(logits - mx)
            inv = pl.reciprocal(jnp.sum(p, axis=0), approx=True)     # [TM, LW]
            out = jnp.sum(p * xl, axis=0) * inv                      # [TM, LW]
            hout_ref[...] = jnp.maximum(out + bias, 0.0).astype(hout_ref.dtype)
            # Betas replicated across each head's C lanes -> fully lane-dense store.
            beta_ref[...] = (p * inv[None]).astype(beta_ref.dtype)   # [Rsrc, TM, LW]


# --------------------------------------------------------------------------- #
# Wrapper: lane packing, parameter packing, tiling over node groups.
# --------------------------------------------------------------------------- #
def metapath_gat_forward(relation_embs, params, *, attn_heads, n_layers,
                         tile_nodes=512, compute_dtype=jnp.bfloat16):
    N, R, D = relation_embs.shape
    wl, bl, wr, br, att, bias = (params[k] for k in
                                 ("wl", "bl", "wr", "br", "att", "bias"))
    L, _, HC = wl.shape
    H = attn_heads
    C = HC // H
    assert L == n_layers and HC == H * C
    assert HC == D, "stacked GATv2 layers require heads * out_channels == embedding_dim"

    P, S = _packing(D, HC)          # P nodes per 128-lane row, each in an S-wide slot
    LW = P * S

    # ---------------- parameter packing (tiny, XLA side) ----------------
    eye_p = jnp.eye(P, dtype=jnp.float32)
    eye_h = jnp.eye(H, dtype=jnp.float32)

    def pad2(w):                    # [a, b] -> zero-padded [S, S]
        return jnp.pad(w, ((0, S - w.shape[0]), (0, S - w.shape[1])))

    def pad_row(b):                 # [1, HC] -> [1, P*S] (same bias in every slot)
        return jnp.tile(jnp.pad(b, ((0, 0), (0, S - b.shape[1]))), (1, P))

    # Head-replicated attention matrix: attA[h*C+c, h'*C+c'] = att[h, c] * (h == h').
    blockrep = att[:, :, :, None] * eye_h[None, :, None, :]                # [L, H, C, H]
    attA = jnp.broadcast_to(blockrep[:, :, :, :, None],
                            (L, H, C, H, C)).reshape(L, HC, HC)

    wf_l, attA_l, bf_l, bias_l = [], [], [], []
    for l in range(L):
        wl_bd = jnp.kron(eye_p, pad2(wl[l]))                                # [LW, LW]
        wr_bd = jnp.kron(eye_p, pad2(wr[l]))
        wf_l.append(jnp.concatenate([wl_bd, wr_bd], axis=1))                # [LW, 2*LW]
        attA_l.append(jnp.kron(eye_p, pad2(attA[l])))                       # [LW, LW]
        bf_l.append(jnp.concatenate([pad_row(bl[l]), pad_row(br[l])], axis=1))
        bias_l.append(pad_row(bias[l]))
    wf_pk = jnp.stack(wf_l).astype(compute_dtype)        # [L, LW, 2*LW]
    attA_pk = jnp.stack(attA_l).astype(compute_dtype)    # [L, LW, LW]
    bf_pk = jnp.stack(bf_l)                              # [L, 1, 2*LW] f32
    bias_pk = jnp.stack(bias_l)                          # [L, 1, LW]   f32

    # ---------------- tiling over node groups ----------------
    MG = -(-N // P)                                      # node groups (P nodes each)
    tile_m = max(8, min(_round_up(-(-tile_nodes // P), 8), _round_up(MG, 8)))
    # v7x megacore: guarantee >= 2 grid steps when there is enough work to split.
    if _round_up(MG, 8) > 8 and _round_up(MG, tile_m) <= tile_m:
        tile_m = max(8, _round_up(-(-MG // 2), 8))
    MGp = _round_up(MG, tile_m)
    Np = MGp * P

    # ---------------- input packing: [N, R, D] -> [R, MGp, P*S] ----------------
    x = jnp.pad(relation_embs, ((0, Np - N), (0, 0), (0, S - D)))
    x_pk = jnp.transpose(x, (1, 0, 2)).reshape(R, MGp, LW)

    grid = (MGp // tile_m,)
    full3 = lambda a: pl.BlockSpec(a.shape, lambda i: (0, 0, 0))

    cost = pl.CostEstimate(
        flops=int(2 * Np * n_layers * R * S * (2 * S)
                  + 2 * Np * ((n_layers - 1) * R * R + R) * S * S),
        transcendentals=int(Np * ((n_layers - 1) * R * R + R) * S),
        bytes_accessed=int(x_pk.size * x_pk.dtype.itemsize
                           + MGp * LW * jnp.dtype(relation_embs.dtype).itemsize
                           + R * MGp * LW * 4
                           + wf_pk.size * wf_pk.dtype.itemsize
                           + attA_pk.size * attA_pk.dtype.itemsize
                           + (bf_pk.size + bias_pk.size) * 4))

    kernel = functools.partial(_metapath_gat_kernel, n_layers=n_layers, n_rel=R,
                               compute_dtype=compute_dtype)

    hout_pk, beta_pk = pl.pallas_call(
        kernel,
        out_shape=(jax.ShapeDtypeStruct((MGp, LW), relation_embs.dtype),
                   jax.ShapeDtypeStruct((R, MGp, LW), jnp.float32)),
        grid=grid,
        in_specs=[
            pl.BlockSpec((R, tile_m, LW), lambda i: (0, i, 0)),     # packed activations
            full3(wf_pk), full3(bf_pk), full3(attA_pk), full3(bias_pk),
        ],
        out_specs=(
            pl.BlockSpec((tile_m, LW), lambda i: (i, 0)),           # packed node embeddings
            pl.BlockSpec((R, tile_m, LW), lambda i: (0, i, 0)),     # replicated betas slab
        ),
        compiler_params=pltpu.CompilerParams(
            dimension_semantics=("parallel",),
            vmem_limit_bytes=40 * 1024 * 1024),
        cost_estimate=cost,
    )(x_pk, wf_pk, bf_pk, attA_pk, bias_pk)

    # ---------------- unpack outputs ----------------
    h_out = hout_pk.reshape(MGp * P, S)[:N, :HC]                         # [N, HC]
    b = beta_pk.reshape(R, MGp, P, S)
    b = jnp.transpose(b, (1, 2, 0, 3)).reshape(MGp * P, R, S)[:N, :, :HC]
    betas = b.reshape(N, R, H, C)[..., 0]                                # [N, R, H]
    return h_out, betas


# --------------------------------------------------------------------------- #
# Deterministic parameter init (GATv2Conv shapes: lin_l/lin_r [D, H*C], att
# [H, C], output bias [H*C]).  Synthetic; not a checkpoint load.
# --------------------------------------------------------------------------- #
def init_params(key, embedding_dim, n_layers, attn_heads):
    D = embedding_dim
    H = attn_heads
    C = D // H
    HC = H * C

    def glorot(k, shape, fan_in, fan_out):
        lim = np.sqrt(6.0 / (fan_in + fan_out))
        return jax.random.uniform(k, shape, jnp.float32, -lim, lim)

    keys = jax.random.split(key, n_layers * 6)
    wl, bl, wr, br, att, bias = [], [], [], [], [], []
    for l in range(n_layers):
        k = keys[l * 6:(l + 1) * 6]
        wl.append(glorot(k[0], (D, HC), D, HC))
        wr.append(glorot(k[1], (D, HC), D, HC))
        bl.append(0.05 * jax.random.normal(k[2], (1, HC), jnp.float32))
        br.append(0.05 * jax.random.normal(k[3], (1, HC), jnp.float32))
        att.append(glorot(k[4], (H, C), H, C))
        bias.append(0.05 * jax.random.normal(k[5], (1, HC), jnp.float32))
    stack = lambda xs: jnp.stack(xs, axis=0)
    return dict(wl=stack(wl), bl=stack(bl), wr=stack(wr), br=stack(br),
                att=stack(att), bias=stack(bias))


# --------------------------------------------------------------------------- #
# Pure-JAX reference (mirrors the dense semantics of the PyTorch forward).
# --------------------------------------------------------------------------- #
def reference_forward(relation_embs, params, *, attn_heads, n_layers):
    wl, bl, wr, br, att, bias = (params[k] for k in
                                 ("wl", "bl", "wr", "br", "att", "bias"))
    N, R, D = relation_embs.shape
    H = attn_heads
    HC = wl.shape[-1]
    C = HC // H

    h = jax.nn.relu(relation_embs)
    h_out, betas = None, None
    for l in range(n_layers):
        hf = h.reshape(N * R, -1)
        xl = (hf @ wl[l] + bl[l]).reshape(N, R, H, C)
        xr = (hf @ wr[l] + br[l]).reshape(N, R, H, C)
        is_last = (l + 1 == n_layers)
        dsts = [R - 1] if is_last else list(range(R))
        outs = []
        for d in dsts:
            s = jax.nn.leaky_relu(xl + xr[:, d:d + 1], negative_slope=0.2)
            logits = jnp.einsum('nrhc,hc->nrh', s, att[l])
            alpha = jax.nn.softmax(logits, axis=1)
            out = jnp.einsum('nrh,nrhc->nhc', alpha, xl).reshape(N, HC)
            outs.append(out + bias[l])
            if is_last:
                betas = alpha
        if is_last:
            h_out = jax.nn.relu(outs[0])
        else:
            h = jax.nn.relu(jnp.stack(outs, axis=1))
    return h_out, betas


if __name__ == "__main__":
    embedding_dim = 32
    attn_heads = 4
    n_layers = 2
    metapaths = [("A", "r1", "B"), ("B", "r2", "A"),
                 ("A", "r3", "C"), ("C", "r4", "A")]
    n_relations = len(metapaths) + 1          # 4 metapaths + self relation = 5

    key = jax.random.PRNGKey(0)
    k_x, k_p, k_x2 = jax.random.split(key, 3)
    params = init_params(k_p, embedding_dim, n_layers, attn_heads)

    # Small, non-aligned node count: exercises node padding + 4-row lane packing.
    num_nodes = 20
    relation_embs = jax.random.normal(
        k_x, (num_nodes, n_relations, embedding_dim), jnp.float32)
    ref_h, ref_b = reference_forward(
        relation_embs, params, attn_heads=attn_heads, n_layers=n_layers)

    # f32 MXU inputs: tight check against the pure-JAX reference.
    h32, b32 = metapath_gat_forward(
        relation_embs, params, attn_heads=attn_heads, n_layers=n_layers,
        compute_dtype=jnp.float32)
    (h32, b32) = jax.block_until_ready((h32, b32))
    assert h32.shape == (num_nodes, embedding_dim)
    assert b32.shape == (num_nodes, n_relations, attn_heads)
    assert np.allclose(np.asarray(h32), np.asarray(ref_h), rtol=1e-2, atol=1e-2), \
        "node embedding mismatch (f32)"
    assert np.allclose(np.asarray(b32), np.asarray(ref_b), rtol=1e-2, atol=1e-2), \
        "attention (betas) mismatch (f32)"

    # bf16 MXU inputs (default fast path): looser tolerance.
    h_out, betas = metapath_gat_forward(
        relation_embs, params, attn_heads=attn_heads, n_layers=n_layers)
    (h_out, betas) = jax.block_until_ready((h_out, betas))
    assert np.allclose(np.asarray(h_out), np.asarray(ref_h), rtol=5e-2, atol=5e-2), \
        "node embedding mismatch (bf16)"
    assert np.allclose(np.asarray(betas), np.asarray(ref_b), rtol=5e-2, atol=5e-2), \
        "attention (betas) mismatch (bf16)"

    # Larger node count: exercises a multi-step grid (megacore "parallel" path).
    num_nodes2 = 100
    relation_embs2 = jax.random.normal(
        k_x2, (num_nodes2, n_relations, embedding_dim), jnp.float32)
    ref_h2, ref_b2 = reference_forward(
        relation_embs2, params, attn_heads=attn_heads, n_layers=n_layers)
    h2, b2 = metapath_gat_forward(
        relation_embs2, params, attn_heads=attn_heads, n_layers=n_layers,
        compute_dtype=jnp.float32)
    (h2, b2) = jax.block_until_ready((h2, b2))
    assert np.allclose(np.asarray(h2), np.asarray(ref_h2), rtol=1e-2, atol=1e-2), \
        "node embedding mismatch (multi-tile)"
    assert np.allclose(np.asarray(b2), np.asarray(ref_b2), rtol=1e-2, atol=1e-2), \
        "attention (betas) mismatch (multi-tile)"

    print("KERNEL_OK")
</pallas_src>

<mosaic_0001>
module attributes {stable_mosaic.version = 11 : i64} {
  func.func @_metapath_gat_kernel(%arg0: i32, %arg1: memref<5x8x128xf32, #tpu.memory_space<vmem>>, %arg2: memref<2x128x256xf32, #tpu.memory_space<vmem>>, %arg3: memref<2x1x256xf32, #tpu.memory_space<vmem>>, %arg4: memref<2x128x128xf32, #tpu.memory_space<vmem>>, %arg5: memref<2x1x128xf32, #tpu.memory_space<vmem>>, %arg6: memref<8x128xf32, #tpu.memory_space<vmem>>, %arg7: memref<5x8x128xf32, #tpu.memory_space<vmem>>) attributes {dimension_semantics = [#tpu.dimension_semantics<parallel>], iteration_bounds = array<i64: 1>, scalar_prefetch = 0 : i64, scratch_operands = 0 : i64, tpu.core_type = #tpu.core_type<tc>, window_params = [{transform_indices = @transform_0, window_bounds = array<i64: 5, 8, 128>}, {pipeline_mode = #tpu.pipeline_mode<synchronous>, transform_indices = @transform_1, window_bounds = array<i64: 2, 128, 256>}, {pipeline_mode = #tpu.pipeline_mode<synchronous>, transform_indices = @transform_2, window_bounds = array<i64: 2, 1, 256>}, {pipeline_mode = #tpu.pipeline_mode<synchronous>, transform_indices = @transform_3, window_bounds = array<i64: 2, 128, 128>}, {pipeline_mode = #tpu.pipeline_mode<synchronous>, transform_indices = @transform_4, window_bounds = array<i64: 2, 1, 128>}, {transform_indices = @transform_5, window_bounds = array<i64: 8, 128>}, {transform_indices = @transform_6, window_bounds = array<i64: 5, 8, 128>}]} {
    %c0 = arith.constant 0 : index
    %c0_0 = arith.constant 0 : index
    %c0_1 = arith.constant 0 : index
    %0 = vector.load %arg1[%c0, %c0_0, %c0_1] : memref<5x8x128xf32, #tpu.memory_space<vmem>>, vector<5x8x128xf32>
    %cst = arith.constant 0.000000e+00 : f32
    %1 = vector.broadcast %cst : f32 to vector<5x8x128xf32>
    %2 = arith.maximumf %0, %1 : vector<5x8x128xf32>
    %c0_2 = arith.constant 0 : index
    %c0_3 = arith.constant 0 : index
    %c0_4 = arith.constant 0 : index
    %3 = vector.load %arg2[%c0_2, %c0_3, %c0_4] : memref<2x128x256xf32, #tpu.memory_space<vmem>>, vector<1x128x256xf32>
    %4 = vector.shape_cast %3 : vector<1x128x256xf32> to vector<128x256xf32>
    %c0_5 = arith.constant 0 : index
    %c0_6 = arith.constant 0 : index
    %c0_7 = arith.constant 0 : index
    %5 = vector.load %arg3[%c0_5, %c0_6, %c0_7] : memref<2x1x256xf32, #tpu.memory_space<vmem>>, vector<1x1x256xf32>
    %6 = vector.shape_cast %5 : vector<1x1x256xf32> to vector<1x256xf32>
    %c0_8 = arith.constant 0 : index
    %c0_9 = arith.constant 0 : index
    %c0_10 = arith.constant 0 : index
    %7 = vector.load %arg4[%c0_8, %c0_9, %c0_10] : memref<2x128x128xf32, #tpu.memory_space<vmem>>, vector<1x128x128xf32>
    %8 = vector.shape_cast %7 : vector<1x128x128xf32> to vector<128x128xf32>
    %c0_11 = arith.constant 0 : index
    %c0_12 = arith.constant 0 : index
    %c0_13 = arith.constant 0 : index
    %9 = vector.load %arg5[%c0_11, %c0_12, %c0_13] : memref<2x1x128xf32, #tpu.memory_space<vmem>>, vector<1x1x128xf32>
    %10 = vector.shape_cast %9 : vector<1x1x128xf32> to vector<1x128xf32>
    %11 = vector.shape_cast %2 : vector<5x8x128xf32> to vector<40x128xf32>
    %cst_14 = arith.constant dense<0.000000e+00> : vector<40x256xf32>
    %12 = tpu.matmul %11, %4, %cst_14 {dimension_numbers = #tpu.dot_dimension_numbers<[1], [0], [0], [1], [0, 0, 1, 1], [], []>} : vector<40x128xf32>, vector<128x256xf32>, vector<40x256xf32> -> vector<40x256xf32>
    %13 = vector.broadcast %6 : vector<1x256xf32> to vector<40x256xf32>
    %14 = arith.addf %12, %13 : vector<40x256xf32>
    %15 = vector.extract_strided_slice %14 {offsets = [0, 0], sizes = [40, 128], strides = [1, 1]} : vector<40x256xf32> to vector<40x128xf32>
    %16 = vector.shape_cast %15 : vector<40x128xf32> to vector<5x8x128xf32>
    %17 = vector.extract_strided_slice %14 {offsets = [0, 128], sizes = [40, 128], strides = [1, 1]} : vector<40x256xf32> to vector<40x128xf32>
    %18 = vector.shape_cast %17 : vector<40x128xf32> to vector<5x8x128xf32>
    %19 = vector.shape_cast %16 : vector<5x8x128xf32> to vector<5x1x8x128xf32>
    %20 = vector.shape_cast %18 : vector<5x8x128xf32> to vector<1x5x8x128xf32>
    %21 = vector.broadcast %19 : vector<5x1x8x128xf32> to vector<5x5x8x128xf32>
    %22 = vector.broadcast %20 : vector<1x5x8x128xf32> to vector<5x5x8x128xf32>
    %23 = arith.addf %21, %22 : vector<5x5x8x128xf32>
    %cst_15 = arith.constant 0.000000e+00 : f32
    %24 = vector.broadcast %cst_15 : f32 to vector<5x5x8x128xf32>
    %25 = arith.cmpf oge, %23, %24 : vector<5x5x8x128xf32>
    %cst_16 = arith.constant 2.000000e-01 : f32
    %26 = vector.broadcast %cst_16 : f32 to vector<5x5x8x128xf32>
    %27 = arith.mulf %26, %23 : vector<5x5x8x128xf32>
    %28 = arith.select %25, %23, %27 : vector<5x5x8x128xi1>, vector<5x5x8x128xf32>
    %29 = vector.shape_cast %28 : vector<5x5x8x128xf32> to vector<200x128xf32>
    %cst_17 = arith.constant dense<0.000000e+00> : vector<200x128xf32>
    %30 = tpu.matmul %29, %8, %cst_17 {dimension_numbers = #tpu.dot_dimension_numbers<[1], [0], [0], [1], [0, 0, 1, 1], [], []>} : vector<200x128xf32>, vector<128x128xf32>, vector<200x128xf32> -> vector<200x128xf32>
    %31 = vector.shape_cast %30 : vector<200x128xf32> to vector<5x5x8x128xf32>
    %cst_18 = arith.constant dense<0xFF800000> : vector<5x8x128xf32>
    %32 = vector.multi_reduction <maximumf>, %31, %cst_18 [0] : vector<5x5x8x128xf32> to vector<5x8x128xf32>
    %33 = vector.shape_cast %32 : vector<5x8x128xf32> to vector<1x5x8x128xf32>
    %34 = vector.broadcast %33 : vector<1x5x8x128xf32> to vector<5x5x8x128xf32>
    %35 = arith.subf %31, %34 : vector<5x5x8x128xf32>
    %36 = math.exp %35 : vector<5x5x8x128xf32>
    %cst_19 = arith.constant dense<0.000000e+00> : vector<5x8x128xf32>
    %37 = vector.multi_reduction <add>, %36, %cst_19 [0] : vector<5x5x8x128xf32> to vector<5x8x128xf32>
    %38 = tpu.reciprocal %37 {approx = true} : vector<5x8x128xf32> -> vector<5x8x128xf32>
    %39 = vector.shape_cast %16 : vector<5x8x128xf32> to vector<5x1x8x128xf32>
    %40 = vector.broadcast %39 : vector<5x1x8x128xf32> to vector<5x5x8x128xf32>
    %41 = arith.mulf %36, %40 : vector<5x5x8x128xf32>
    %cst_20 = arith.constant dense<0.000000e+00> : vector<5x8x128xf32>
    %42 = vector.multi_reduction <add>, %41, %cst_20 [0] : vector<5x5x8x128xf32> to vector<5x8x128xf32>
    %43 = arith.mulf %42, %38 : vector<5x8x128xf32>
    %44 = vector.shape_cast %10 : vector<1x128xf32> to vector<1x1x128xf32>
    %45 = vector.broadcast %44 : vector<1x1x128xf32> to vector<5x8x128xf32>
    %46 = arith.addf %43, %45 : vector<5x8x128xf32>
    %cst_21 = arith.constant 0.000000e+00 : f32
    %47 = vector.broadcast %cst_21 : f32 to vector<5x8x128xf32>
    %48 = arith.maximumf %46, %47 : vector<5x8x128xf32>
    %c1 = arith.constant 1 : index
    %c0_22 = arith.constant 0 : index
    %c0_23 = arith.constant 0 : index
    %49 = vector.load %arg2[%c1, %c0_22, %c0_23] : memref<2x128x256xf32, #tpu.memory_space<vmem>>, vector<1x128x256xf32>
    %50 = vector.shape_cast %49 : vector<1x128x256xf32> to vector<128x256xf32>
    %c1_24 = arith.constant 1 : index
    %c0_25 = arith.constant 0 : index
    %c0_26 = arith.constant 0 : index
    %51 = vector.load %arg3[%c1_24, %c0_25, %c0_26] : memref<2x1x256xf32, #tpu.memory_space<vmem>>, vector<1x1x256xf32>
    %52 = vector.shape_cast %51 : vector<1x1x256xf32> to vector<1x256xf32>
    %c1_27 = arith.constant 1 : index
    %c0_28 = arith.constant 0 : index
    %c0_29 = arith.constant 0 : index
    %53 = vector.load %arg4[%c1_27, %c0_28, %c0_29] : memref<2x128x128xf32, #tpu.memory_space<vmem>>, vector<1x128x128xf32>
    %54 = vector.shape_cast %53 : vector<1x128x128xf32> to vector<128x128xf32>
    %c1_30 = arith.constant 1 : index
    %c0_31 = arith.constant 0 : index
    %c0_32 = arith.constant 0 : index
    %55 = vector.load %arg5[%c1_30, %c0_31, %c0_32] : memref<2x1x128xf32, #tpu.memory_space<vmem>>, vector<1x1x128xf32>
    %56 = vector.shape_cast %55 : vector<1x1x128xf32> to vector<1x128xf32>
    %57 = vector.shape_cast %48 : vector<5x8x128xf32> to vector<40x128xf32>
    %cst_33 = arith.constant dense<0.000000e+00> : vector<40x256xf32>
    %58 = tpu.matmul %57, %50, %cst_33 {dimension_numbers = #tpu.dot_dimension_numbers<[1], [0], [0], [1], [0, 0, 1, 1], [], []>} : vector<40x128xf32>, vector<128x256xf32>, vector<40x256xf32> -> vector<40x256xf32>
    %59 = vector.broadcast %52 : vector<1x256xf32> to vector<40x256xf32>
    %60 = arith.addf %58, %59 : vector<40x256xf32>
    %61 = vector.extract_strided_slice %60 {offsets = [0, 0], sizes = [40, 128], strides = [1, 1]} : vector<40x256xf32> to vector<40x128xf32>
    %62 = vector.shape_cast %61 : vector<40x128xf32> to vector<5x8x128xf32>
    %63 = vector.extract_strided_slice %60 {offsets = [0, 128], sizes = [40, 128], strides = [1, 1]} : vector<40x256xf32> to vector<40x128xf32>
    %64 = vector.shape_cast %63 : vector<40x128xf32> to vector<5x8x128xf32>
    %65 = vector.extract_strided_slice %64 {offsets = [4, 0, 0], sizes = [1, 8, 128], strides = [1, 1, 1]} : vector<5x8x128xf32> to vector<1x8x128xf32>
    %66 = vector.shape_cast %65 : vector<1x8x128xf32> to vector<8x128xf32>
    %67 = vector.shape_cast %66 : vector<8x128xf32> to vector<1x8x128xf32>
    %68 = vector.broadcast %67 : vector<1x8x128xf32> to vector<5x8x128xf32>
    %69 = arith.addf %62, %68 : vector<5x8x128xf32>
    %cst_34 = arith.constant 0.000000e+00 : f32
    %70 = vector.broadcast %cst_34 : f32 to vector<5x8x128xf32>
    %71 = arith.cmpf oge, %69, %70 : vector<5x8x128xf32>
    %cst_35 = arith.constant 2.000000e-01 : f32
    %72 = vector.broadcast %cst_35 : f32 to vector<5x8x128xf32>
    %73 = arith.mulf %72, %69 : vector<5x8x128xf32>
    %74 = arith.select %71, %69, %73 : vector<5x8x128xi1>, vector<5x8x128xf32>
    %75 = vector.shape_cast %74 : vector<5x8x128xf32> to vector<40x128xf32>
    %cst_36 = arith.constant dense<0.000000e+00> : vector<40x128xf32>
    %76 = tpu.matmul %75, %54, %cst_36 {dimension_numbers = #tpu.dot_dimension_numbers<[1], [0], [0], [1], [0, 0, 1, 1], [], []>} : vector<40x128xf32>, vector<128x128xf32>, vector<40x128xf32> -> vector<40x128xf32>
    %77 = vector.shape_cast %76 : vector<40x128xf32> to vector<5x8x128xf32>
    %cst_37 = arith.constant dense<0xFF800000> : vector<8x128xf32>
    %78 = vector.multi_reduction <maximumf>, %77, %cst_37 [0] : vector<5x8x128xf32> to vector<8x128xf32>
    %79 = vector.shape_cast %78 : vector<8x128xf32> to vector<1x8x128xf32>
    %80 = vector.broadcast %79 : vector<1x8x128xf32> to vector<5x8x128xf32>
    %81 = arith.subf %77, %80 : vector<5x8x128xf32>
    %82 = math.exp %81 : vector<5x8x128xf32>
    %cst_38 = arith.constant dense<0.000000e+00> : vector<8x128xf32>
    %83 = vector.multi_reduction <add>, %82, %cst_38 [0] : vector<5x8x128xf32> to vector<8x128xf32>
    %84 = tpu.reciprocal %83 {approx = true} : vector<8x128xf32> -> vector<8x128xf32>
    %85 = arith.mulf %82, %62 : vector<5x8x128xf32>
    %cst_39 = arith.constant dense<0.000000e+00> : vector<8x128xf32>
    %86 = vector.multi_reduction <add>, %85, %cst_39 [0] : vector<5x8x128xf32> to vector<8x128xf32>
    %87 = arith.mulf %86, %84 : vector<8x128xf32>
    %88 = vector.broadcast %56 : vector<1x128xf32> to vector<8x128xf32>
    %89 = arith.addf %87, %88 : vector<8x128xf32>
    %cst_40 = arith.constant 0.000000e+00 : f32
    %90 = vector.broadcast %cst_40 : f32 to vector<8x128xf32>
    %91 = arith.maximumf %89, %90 : vector<8x128xf32>
    %c0_41 = arith.constant 0 : index
    %c0_42 = arith.constant 0 : index
    %92 = vector.load %arg6[%c0_41, %c0_42] : memref<8x128xf32, #tpu.memory_space<vmem>>, vector<8x128xf32>
    tpu.vector_store %arg6[%c0_41, %c0_42], %91 {strides = array<i32>} : memref<8x128xf32, #tpu.memory_space<vmem>>, vector<8x128xf32>,
    %93 = vector.shape_cast %84 : vector<8x128xf32> to vector<1x8x128xf32>
    %94 = vector.broadcast %93 : vector<1x8x128xf32> to vector<5x8x128xf32>
    %95 = arith.mulf %82, %94 : vector<5x8x128xf32>
    %c0_43 = arith.constant 0 : index
    %c0_44 = arith.constant 0 : index
    %c0_45 = arith.constant 0 : index
    %96 = vector.load %arg7[%c0_43, %c0_44, %c0_45] : memref<5x8x128xf32, #tpu.memory_space<vmem>>, vector<5x8x128xf32>
    tpu.vector_store %arg7[%c0_43, %c0_44, %c0_45], %95 {strides = array<i32>} : memref<5x8x128xf32, #tpu.memory_space<vmem>>, vector<5x8x128xf32>,
    return
  }
  func.func @transform_0(%arg0: i32) -> (i32, i32, i32) {
    %c0_i32 = arith.constant 0 : i32
    %c0_i32_0 = arith.constant 0 : i32
    %c0_i32_1 = arith.constant 0 : i32
    return %c0_i32, %arg0, %c0_i32_0 : i32, i32, i32
  }
  func.func @transform_1(%arg0: i32) -> (i32, i32, i32) {
    %c0_i32 = arith.constant 0 : i32
    %c0_i32_0 = arith.constant 0 : i32
    %c0_i32_1 = arith.constant 0 : i32
    %c0_i32_2 = arith.constant 0 : i32
    return %c0_i32, %c0_i32_0, %c0_i32_1 : i32, i32, i32
  }
  func.func @transform_2(%arg0: i32) -> (i32, i32, i32) {
    %c0_i32 = arith.constant 0 : i32
    %c0_i32_0 = arith.constant 0 : i32
    %c0_i32_1 = arith.constant 0 : i32
    %c0_i32_2 = arith.constant 0 : i32
    return %c0_i32, %c0_i32_0, %c0_i32_1 : i32, i32, i32
  }
  func.func @transform_3(%arg0: i32) -> (i32, i32, i32) {
    %c0_i32 = arith.constant 0 : i32
    %c0_i32_0 = arith.constant 0 : i32
    %c0_i32_1 = arith.constant 0 : i32
    %c0_i32_2 = arith.constant 0 : i32
    return %c0_i32, %c0_i32_0, %c0_i32_1 : i32, i32, i32
  }
  func.func @transform_4(%arg0: i32) -> (i32, i32, i32) {
    %c0_i32 = arith.constant 0 : i32
    %c0_i32_0 = arith.constant 0 : i32
    %c0_i32_1 = arith.constant 0 : i32
    %c0_i32_2 = arith.constant 0 : i32
    return %c0_i32, %c0_i32_0, %c0_i32_1 : i32, i32, i32
  }
  func.func @transform_5(%arg0: i32) -> (i32, i32) {
    %c0_i32 = arith.constant 0 : i32
    %c0_i32_0 = arith.constant 0 : i32
    return %arg0, %c0_i32 : i32, i32
  }
  func.func @transform_6(%arg0: i32) -> (i32, i32, i32) {
    %c0_i32 = arith.constant 0 : i32
    %c0_i32_0 = arith.constant 0 : i32
    %c0_i32_1 = arith.constant 0 : i32
    return %c0_i32, %arg0, %c0_i32_0 : i32, i32, i32
  }
}

</mosaic_0001>

<bundles_post_ra>
// kernel: tpu_custom_call.1
= control target key start
LH: loop header
LB: loop body
LE: loop exit
PB: predicated region body
PF: predicated region fallthrough
CT: control target
= control target key end

     0   :  { %12 = vsyncpa [#allocation3], 0  ;;  %s2026_s0 = inlined_call_operand.hbm [shape: f32[5,8,128], index: 0, kind: input, shape index: {}]   ;;  %s2027_s1 = inlined_call_operand.hbm [shape: f32[2,128,256], index: 1, kind: input, shape index: {}]   ;;  %s2028_s2 = inlined_call_operand.vmem [shape: f32[2,1,256], index: 2, kind: input, shape index: {}]   ;;  %s2029_s3 = inlined_call_operand.hbm [shape: f32[2,128,128], index: 3, kind: input, shape index: {}]   ;;  %s2030_s4 = inlined_call_operand.vmem [shape: f32[2,1,128], index: 4, kind: input, shape index: {}]   ;;  %s2031_s5 = inlined_call_operand.hbm [shape: f32[8,128], index: 5, kind: output, shape index: {0}]   ;;  %s2032_s6 = inlined_call_operand.hbm [shape: f32[5,8,128], index: 6, kind: output, shape index: {1}]  }
   0x1   :  { %13 = vsyncpa [#allocation6], 0 }
   0x2   :  { %14 = vsyncpa [#allocation4], 0 }
   0x3   :  { %15 = vsyncpa [#allocation10], 0  ;;  %s1592_s21 = smov [#allocation5]   ;;  %s1474_s25 = scalar_lea.hbm %s2027_s1, 8192 }
   0x4   :  { %s33_s22 = sshll.u32 %s1592_s21, 4  ;;  %p1475_p0 = scmp.ne.s32.totalorder %s2027_s1, %s1474_s25  ;;  %s34_s22 = int_to_ptr.vmem [resolvable:$true] %s33_s22 }
   0x5   :  { %p1478_p1 = scmp.lt.u32.totalorder %s1474_s25, %s2027_s1 }
   0x7   :  { %p1480_p2 = pnand %p1478_p1, %p1475_p0 }
   0x9   :  { %1483 = shalt.err (!%p1480_p2)
}
   0xa   :  { %s1484_s30 = scalar_lea.vmem %s34_s22, 8192  ;;  %p1489_p4 = scmp.lt.s32.totalorder %s34_s22, %s34_s22 }
   0xb   :  { %p1485_p3 = scmp.ne.s32.totalorder %s34_s22, %s1484_s30  ;;  %p1490_p5 = scmp.lt.s32.totalorder %s1484_s30, %s1484_s30 }
   0xd   :  { %p1491_p6 = por %p1490_p5, %p1489_p4 }
   0xf   :  { %p1492_p7 = pnand %p1491_p6, %p1485_p3 }
  0x11   :  { %1495 = shalt.err (!%p1492_p7)
}
  0x12   :  { %s1593_s7 = smov 256   ;;  %s1594_s8 = smov 16  }
  0x13   :  { %39 = dma.hbm_to_vmem [thread:$0]  %s2027_s1, 8192, %s34_s22, [#allocation6], %s1593_s7, %s1593_s7, %s1594_s8  }
  0x14   :  { %s1595_s11 = smov [#allocation2]   ;;  %s1496_s15 = scalar_lea.hbm %s2026_s0, 640 }
  0x15   :  { %s21_s12 = sshll.u32 %s1595_s11, 4  ;;  %p1497_p8 = scmp.ne.s32.totalorder %s2026_s0, %s1496_s15  ;;  %s22_s12 = int_to_ptr.vmem [resolvable:$true] %s21_s12 }
  0x16   :  { %p1500_p9 = scmp.lt.u32.totalorder %s1496_s15, %s2026_s0 }
  0x18   :  { %p1502_p10 = pnand %p1500_p9, %p1497_p8 }
  0x1a   :  { %1505 = shalt.err (!%p1502_p10)
}
  0x1b   :  { %s1506_s20 = scalar_lea.vmem %s22_s12, 640  ;;  %p1511_p12 = scmp.lt.s32.totalorder %s22_s12, %s22_s12 }
  0x1c   :  { %p1507_p11 = scmp.ne.s32.totalorder %s22_s12, %s1506_s20  ;;  %p1512_p13 = scmp.lt.s32.totalorder %s1506_s20, %s1506_s20 }
  0x1e   :  { %p1513_p0 = por %p1512_p13, %p1511_p12 }
  0x20   :  { %p1514_p1 = pnand %p1513_p0, %p1507_p11 }
  0x22   :  { %1517 = shalt.err (!%p1514_p1)
}
  0x23   :  { %s1596_s1 = smov 128   ;;  %s1597_s21 = smov 8  }
  0x24   :  { %27 = dma.hbm_to_vmem [thread:$0]  %s2026_s0, 640, %s22_s12, [#allocation3], %s1596_s1, %s1596_s1, %s1597_s21  }
  0x25   :  { %s1598_s24 = smov [#allocation7]   ;;  %s1518_s28 = scalar_lea.hbm %s2029_s3, 4096 }
  0x26   :  { %s47_s25 = sshll.u32 %s1598_s24, 4  ;;  %p1519_p2 = scmp.ne.s32.totalorder %s2029_s3, %s1518_s28  ;;  %s48_s25 = int_to_ptr.vmem [resolvable:$true] %s47_s25 }
  0x27   :  { %p1522_p3 = scmp.lt.u32.totalorder %s1518_s28, %s2029_s3 }
  0x29   :  { %p1524_p4 = pnand %p1522_p3, %p1519_p2 }
  0x2b   :  { %1527 = shalt.err (!%p1524_p4)
}
  0x2c   :  { %s1528_s9 = scalar_lea.vmem %s48_s25, 4096  ;;  %p1533_p6 = scmp.lt.s32.totalorder %s48_s25, %s48_s25 }
  0x2d   :  { %p1529_p5 = scmp.ne.s32.totalorder %s48_s25, %s1528_s9  ;;  %p1534_p7 = scmp.lt.s32.totalorder %s1528_s9, %s1528_s9 }
  0x2f   :  { %p1535_p8 = por %p1534_p7, %p1533_p6 }
  0x31   :  { %p1536_p9 = pnand %p1535_p8, %p1529_p5 }
  0x33   :  { %1539 = shalt.err (!%p1536_p9)
}
  0x34   :  { %53 = dma.hbm_to_vmem [thread:$0]  %s2029_s3, 4096, %s48_s25, [#allocation6], %s1596_s1, %s1596_s1, %s1597_s21  }
  0x35   :  { %1584 = dma.done.wait [#allocation3], 640  }
  0x36   :  { %1585 = vsyncadd [#allocation3], 4294966656 }
  0x37   :  { %1586 = dma.done.wait [#allocation6], 12288  }
  0x38   :  { %1587 = vsyncadd [#allocation6], 4294955008  ;;  %v1599_v0 = vmov 0.0   ;;  %v1600_v1 = vmov 0.0|0.0   ;;  %v76_v2 = vld [vmem:[#allocation5 + $0x8] sm:$0xff]  ;;  %v78_v3 = vld [vmem:[#allocation5 + $0x18] sm:$0xff] }
  0x39   :  { %200 = vmatprep.mubr.f32.mxu0 %v1599_v0  ;;  %1310 = vmatprep.subr.bf16.mxu1 %v1600_v1  ;;  %v75_v4 = vld [vmem:[#allocation5] sm:$0xff]  ;;  %v1278_v5 = vpack.c.bf16 %v78_v3, %v76_v2  ;;  %v77_v6 = vld [vmem:[#allocation5 + $0x10] sm:$0xff]  ;;  %v80_v7 = vld [vmem:[#allocation5 + $0x28] sm:$0xff]  ;;  %vm1601_vm0 = vmmov 0   ;;  %s1603_s19 = smov [#allocation8]  }
  0x3a   :  { %v82_v8 = vld [vmem:[#allocation5 + $0x38] sm:$0xff]  ;;  %v1280_v9 = vpack.c.bf16 %v77_v6, %v75_v4  ;;  %v79_v11 = vld [vmem:[#allocation5 + $0x20] sm:$0xff]  ;;  %v81_v12 = vld [vmem:[#allocation5 + $0x30] sm:$0xff]  ;;  %1156 = vmatprep.mubr.msk.f32.mxu1 %vm1601_vm0, %v1599_v0  ;;  %s1032_s20 = sshll.u32 %s1603_s19, 4  ;;  %s1992_s20 = int_to_ptr.vmem [resolvable:$true] %s1032_s20 }
  0x3b   :  { %v1282_v10 = vpack.c.bf16 %v82_v8, %v80_v7  ;;  %v84_v13 = vld [vmem:[#allocation5 + $0x48] sm:$0xff]  ;;  %1279 = vmatprep.subr.bf16.mxu0 %v1278_v5  ;;  %v86_v14 = vld [vmem:[#allocation5 + $0x58] sm:$0xff]  ;;  %v1284_v15 = vpack.c.bf16 %v81_v12, %v79_v11  ;;  %v83_v17 = vld [vmem:[#allocation5 + $0x40] sm:$0xff] }
  0x3c   :  { %1281 = vmatpush1.bf16.msra.mxu0 %v1280_v9  ;;  %v1286_v16 = vpack.c.bf16 %v86_v14, %v84_v13  ;;  %v85_v18 = vld [vmem:[#allocation5 + $0x50] sm:$0xff]  ;;  %v88_v19 = vld [vmem:[#allocation5 + $0x68] sm:$0xff]  ;;  %v90_v20 = vld [vmem:[#allocation5 + $0x78] sm:$0xff] }
  0x3d   :  { %1283 = vmatprep.subr.bf16.mxu0 %v1282_v10  ;;  %v1288_v21 = vpack.c.bf16 %v85_v18, %v83_v17  ;;  %v1290_v22 = vpack.c.bf16 %v90_v20, %v88_v19  ;;  %v87_v23 = vld [vmem:[#allocation5 + $0x60] sm:$0xff]  ;;  %v89_v24 = vld [vmem:[#allocation5 + $0x70] sm:$0xff]  ;;  %v92_v25 = vld [vmem:[#allocation5 + $0x88] sm:$0xff] }
  0x3e   :  { %v94_v26 = vld [vmem:[#allocation5 + $0x98] sm:$0xff]  ;;  %v1292_v27 = vpack.c.bf16 %v89_v24, %v87_v23  ;;  %v91_v28 = vld [vmem:[#allocation5 + $0x80] sm:$0xff]  ;;  %v109_v30 = vld [vmem:[#allocation7 + $0x8] sm:$0xff] }
  0x3f   :  { %v108_v29 = vld [vmem:[#allocation7] sm:$0xff]  ;;  %v1294_v31 = vpack.c.bf16 %v94_v26, %v92_v25  ;;  %v93_v32 = vld [vmem:[#allocation5 + $0x90] sm:$0xff]  ;;  %v111_v35 = vld [vmem:[#allocation7 + $0x18] sm:$0xff] }
  0x40   :  { %1285 = vmatpush1.bf16.msra.mxu0 %v1284_v15  ;;  %v1311_v33 = vpack.c.bf16 %v109_v30, %v108_v29  ;;  %v110_v34 = vld [vmem:[#allocation7 + $0x10] sm:$0xff]  ;;  %v96_v36 = vld [vmem:[#allocation5 + $0xa8] sm:$0xff]  ;;  %v98_v37 = vld [vmem:[#allocation5 + $0xb8] sm:$0xff]  ;;  %v1296_v39 = vpack.c.bf16 %v93_v32, %v91_v28 }
  0x41   :  { %1287 = vmatprep.subr.bf16.mxu0 %v1286_v16  ;;  %v1314_v38 = vpack.c.bf16 %v111_v35, %v110_v34  ;;  %v112_v40 = vld [vmem:[#allocation7 + $0x20] sm:$0xff]  ;;  %v113_v41 = vld [vmem:[#allocation7 + $0x28] sm:$0xff]  ;;  %v1298_v42 = vpack.c.bf16 %v98_v37, %v96_v36  ;;  %v97_v44 = vld [vmem:[#allocation5 + $0xb0] sm:$0xff] }
  0x42   :  { %1312 = vmatpush3.bf16.msra.mxu1 %v1311_v33  ;;  %v95_v43 = vld [vmem:[#allocation5 + $0xa0] sm:$0xff]  ;;  %v100_v45 = vld [vmem:[#allocation5 + $0xc8] sm:$0xff]  ;;  %v102_v46 = vld [vmem:[#allocation5 + $0xd8] sm:$0xff]  ;;  %v1317_v47 = vpack.c.bf16 %v113_v41, %v112_v40 }
  0x43   :  { %1313 = vmatprep.subr.bf16.mxu1 %v1600_v1  ;;  %v1300_v48 = vpack.c.bf16 %v97_v44, %v95_v43  ;;  %v114_v49 = vld [vmem:[#allocation7 + $0x30] sm:$0xff]  ;;  %v115_v50 = vld [vmem:[#allocation7 + $0x38] sm:$0xff]  ;;  %v1302_v51 = vpack.c.bf16 %v102_v46, %v100_v45  ;;  %v99_v52 = vld [vmem:[#allocation5 + $0xc0] sm:$0xff] }
  0x44   :  { %1289 = vmatpush1.bf16.msra.mxu0 %v1288_v21  ;;  %v101_v53 = vld [vmem:[#allocation5 + $0xd0] sm:$0xff]  ;;  %v104_v54 = vld [vmem:[#allocation5 + $0xe8] sm:$0xff]  ;;  %v106_v55 = vld [vmem:[#allocation5 + $0xf8] sm:$0xff]  ;;  %v1320_v56 = vpack.c.bf16 %v115_v50, %v114_v49 }
  0x45   :  { %1291 = vmatprep.subr.bf16.mxu0 %v1290_v22  ;;  %v1304_v57 = vpack.c.bf16 %v101_v53, %v99_v52  ;;  %v116_v58 = vld [vmem:[#allocation7 + $0x40] sm:$0xff]  ;;  %v117_v59 = vld [vmem:[#allocation7 + $0x48] sm:$0xff]  ;;  %v1306_v60 = vpack.c.bf16 %v106_v55, %v104_v54  ;;  %v105_v62 = vld [vmem:[#allocation5 + $0xf0] sm:$0xff]  ;;  %v126_v22 = vlaneseq }
  0x46   :  { %1315 = vmatpush3.bf16.msra.mxu1 %v1314_v38  ;;  %v103_v61 = vld [vmem:[#allocation5 + $0xe0] sm:$0xff]  ;;  %v1323_v63 = vpack.c.bf16 %v117_v59, %v116_v58  ;;  %v65_v3 = vld [vmem:[#allocation2] sm:$0xff]  ;;  %v118_v4 = vld [vmem:[#allocation7 + $0x50] sm:$0xff] }
  0x47   :  { %1316 = vmatprep.subr.bf16.mxu1 %v1600_v1  ;;  %v1308_v2 = vpack.c.bf16 %v105_v62, %v103_v61  ;;  %v119_v5 = vld [vmem:[#allocation7 + $0x58] sm:$0xff]  ;;  %v70_v6 = vmax.f32 %v65_v3, 0.0  ;;  %v66_v8 = vld [vmem:[#allocation2 + $0x8] sm:$0xff]  ;;  %v67_v10 = vld [vmem:[#allocation2 + $0x10] sm:$0xff]  ;;  %v1697_v23 = vshrl.u32 %v126_v22, 7 }
  0x48   :  { %1293 = vmatpush1.bf16.msra.mxu0 %v1292_v27  ;;  %v1326_v7 = vpack.c.bf16 %v119_v5, %v118_v4  ;;  %v71_v9 = vmax.f32 %v66_v8, 0.0  ;;  %v72_v11 = vmax.f32 %v67_v10, 0.0  ;;  %v68_v12 = vld [vmem:[#allocation2 + $0x18] sm:$0xff]  ;;  %v69_v14 = vld [vmem:[#allocation2 + $0x20] sm:$0xff]  ;;  %v120_v16 = vld [vmem:[#allocation7 + $0x60] sm:$0xff] }
  0x49   :  { %1295 = vmatprep.subr.bf16.mxu0 %v1294_v31  ;;  %v73_v13 = vmax.f32 %v68_v12, 0.0  ;;  %v74_v15 = vmax.f32 %v69_v14, 0.0  ;;  %v121_v17 = vld [vmem:[#allocation7 + $0x68] sm:$0xff]  ;;  %v122_v19 = vld [vmem:[#allocation7 + $0x70] sm:$0xff]  ;;  %v123_v20 = vld [vmem:[#allocation7 + $0x78] sm:$0xff]  ;;  %v128_v24 = vsub.s32 0, %v1697_v23 }
  0x4a   :  { %1318 = vmatpush3.bf16.msra.mxu1 %v1317_v47  ;;  %v1329_v18 = vpack.c.bf16 %v121_v17, %v120_v16  ;;  %v1332_v21 = vpack.c.bf16 %v123_v20, %v122_v19  ;;  %v107_v25 = vld [vmem:[%s2028_s2] sm:$0x3]  ;;  %v132_v26 = vsub.s32 1, %v1697_v23 }
  0x4b   :  { %1319 = vmatprep.subr.bf16.mxu1 %v1600_v1  ;;  %v1706_v27 = vrot.slane %v107_v25, %v128_v24 }
  0x4c   :  { %1297 = vmatpush1.bf16.msra.mxu0 %v1296_v39  ;;  %v133_v28 = vrot.slane %v107_v25, %v132_v26 }
  0x4d   :  { %1299 = vmatprep.subr.bf16.mxu0 %v1298_v42 }
  0x4e   :  { %1321 = vmatpush3.bf16.msra.mxu1 %v1320_v56 }
  0x4f   :  { %1322 = vmatprep.subr.bf16.mxu1 %v1600_v1 }
  0x50   :  { %1301 = vmatpush1.bf16.msra.mxu0 %v1300_v48 }
  0x51   :  { %1303 = vmatprep.subr.bf16.mxu0 %v1302_v51 }
  0x52   :  { %1324 = vmatpush3.bf16.msra.mxu1 %v1323_v63 }
  0x53   :  { %1325 = vmatprep.subr.bf16.mxu1 %v1600_v1 }
  0x54   :  { %1305 = vmatpush1.bf16.msra.mxu0 %v1304_v57 }
  0x55   :  { %1307 = vmatprep.subr.bf16.mxu0 %v1306_v60 }
  0x56   :  { %1327 = vmatpush3.bf16.msra.mxu1 %v1326_v7 }
  0x57   :  { %1328 = vmatprep.subr.bf16.mxu1 %v1600_v1 }
  0x58   :  { %1309 = vmatpush1.bf16.msra.mxu0 %v1308_v2 }
  0x5a   :  { %1330 = vmatpush3.bf16.msra.mxu1 %v1329_v18 }
  0x5b   :  { %201 = vmatmul.mubr.f32.vlgmr.msra.gmra.mrb[0].mxu0 %v70_v6  ;;  %1331 = vmatprep.subr.bf16.mxu1 %v1600_v1 }
  0x5c   :  { %206 = vmatprep.mubr.f32.mxu0 %v1599_v0 }
  0x5e   :  { %1333 = vmatpush3.bf16.msra.mxu1 %v1332_v21 }
  0x5f   :  { %207 = vmatmul.mubr.f32.gmra.mrb[2].mxu0 %v71_v9 }
  0x60   :  { %212 = vmatprep.mubr.f32.mxu0 %v1599_v0 }
  0x63   :  { %213 = vmatmul.mubr.f32.gmra.mrb[4].mxu0 %v72_v11 }
  0x64   :  { %218 = vmatprep.mubr.f32.mxu0 %v1599_v0 }
  0x67   :  { %219 = vmatmul.mubr.f32.gmra.mrb[6].mxu0 %v73_v13 }
  0x68   :  { %224 = vmatprep.mubr.f32.mxu0 %v1599_v0 }
  0x6b   :  { %225 = vmatmul.mubr.f32.gmra.mrb[8].mxu0 %v74_v15 }
  0x6c   :  { %836 = vmatprep.mubr.f32.mxu0 %v1599_v0 }
 0x12e   :  { %v202_v29 = vpop.f32.mrb[0].mxu0 }
 0x12f   :  { %v1711_v30 = vadd.f32 %v202_v29, %v1706_v27  ;;  %v204_v31 = vpop.f32.mrb[1].mxu0 }
 0x130   :  { %v1713_v32 = vadd.f32 %v204_v31, %v133_v28 }
 0x132   :  { %v208_v33 = vpop.f32.mrb[2].mxu0  ;;  %v231_v34 = vadd.f32 %v1713_v32, %v1711_v30 }
 0x133   :  { %v210_v35 = vpop.f32.mrb[3].mxu0  ;;  %v1734_v50 = vadd.f32 %v208_v33, %v1706_v27 }
 0x134   :  { %v1717_v36 = vadd.f32 %v210_v35, %v133_v28  ;;  %vm256_vm1 = vcmp.ge.f32.partialorder %v231_v34, 0.0  ;;  %v281_v37 = vmul.f32 0.2, %v231_v34 }
 0x135   :  { %v236_v60 = vadd.f32 %v1734_v50, %v1713_v32 }
 0x136   :  { %v214_v38 = vpop.f32.mrb[4].mxu0  ;;  %v306_v39 = vsel %vm256_vm1, %v231_v34, %v281_v37  ;;  %v232_v40 = vadd.f32 %v1717_v36, %v1711_v30  ;;  %v237_v2 = vadd.f32 %v1717_v36, %v1734_v50 }
 0x137   :  { %v216_v41 = vpop.f32.mrb[5].mxu0  ;;  %1157 = vmatmul.mubr.f32.vlgmr.msra.gmra.mrb[0].mxu1 %v306_v39  ;;  %v286_v63 = vmul.f32 0.2, %v236_v60  ;;  %vm261_vm6 = vcmp.ge.f32.partialorder %v236_v60, 0.0  ;;  %v1764_v9 = vadd.f32 %v214_v38, %v1706_v27 }
 0x138   :  { %v1721_v42 = vadd.f32 %v216_v41, %v133_v28  ;;  %1159 = vmatprep.mubr.msk.f32.mxu1 %vm1601_vm0, %v1599_v0  ;;  %vm257_vm2 = vcmp.ge.f32.partialorder %v232_v40, 0.0  ;;  %v282_v43 = vmul.f32 0.2, %v232_v40  ;;  %v287_v4 = vmul.f32 0.2, %v237_v2 }
 0x139   :  { %v311_v3 = vsel %vm261_vm6, %v236_v60, %v286_v63  ;;  %vm262_vm7 = vcmp.ge.f32.partialorder %v237_v2, 0.0  ;;  %v241_v15 = vadd.f32 %v1764_v9, %v1713_v32  ;;  %v242_v18 = vadd.f32 %v1764_v9, %v1717_v36 }
 0x13a   :  { %v1725_v44 = vpop.f32.mrb[6].mxu0  ;;  %v307_v45 = vsel %vm257_vm2, %v232_v40, %v282_v43  ;;  %v233_v46 = vadd.f32 %v1721_v42, %v1711_v30  ;;  %v238_v5 = vadd.f32 %v1721_v42, %v1734_v50  ;;  %v312_v6 = vsel %vm262_vm7, %v237_v2, %v287_v4 }
 0x13b   :  { %v222_v47 = vpop.f32.mrb[7].mxu0  ;;  %1160 = vmatmul.mubr.f32.gmra.mrb[2].mxu1 %v307_v45  ;;  %v291_v17 = vmul.f32 0.2, %v241_v15  ;;  %vm266_vm11 = vcmp.ge.f32.partialorder %v241_v15, 0.0  ;;  %v292_v20 = vmul.f32 0.2, %v242_v18  ;;  %v243_v21 = vadd.f32 %v1721_v42, %v1764_v9 }
 0x13c   :  { %v1729_v48 = vadd.f32 %v222_v47, %v133_v28  ;;  %1162 = vmatprep.mubr.msk.f32.mxu1 %vm1601_vm0, %v1599_v0  ;;  %vm258_vm3 = vcmp.ge.f32.partialorder %v233_v46, 0.0  ;;  %v283_v49 = vmul.f32 0.2, %v233_v46  ;;  %v288_v7 = vmul.f32 0.2, %v238_v5 }
 0x13d   :  { %vm263_vm8 = vcmp.ge.f32.partialorder %v238_v5, 0.0  ;;  %v316_v19 = vsel %vm266_vm11, %v241_v15, %v291_v17  ;;  %vm267_vm12 = vcmp.ge.f32.partialorder %v242_v18, 0.0  ;;  %v293_v25 = vmul.f32 0.2, %v243_v21  ;;  %v714_v17 = vld [vmem:[#allocation5 + $0x130] sm:$0xff] }
 0x13e   :  { %v226_v51 = vpop.f32.mrb[8].mxu0  ;;  %v308_v52 = vsel %vm258_vm3, %v233_v46, %v283_v49  ;;  %v234_v53 = vadd.f32 %v1729_v48, %v1711_v30  ;;  %v239_v8 = vadd.f32 %v1729_v48, %v1734_v50  ;;  %v313_v10 = vsel %vm263_vm8, %v238_v5, %v288_v7  ;;  %v709_v7 = vld [vmem:[#allocation5 + $0x108] sm:$0xff] }
 0x13f   :  { %v1739_v54 = vadd.f32 %v226_v51, %v1706_v27  ;;  %v228_v55 = vpop.f32.mrb[9].mxu0  ;;  %1163 = vmatmul.mubr.f32.gmra.mrb[4].mxu1 %v308_v52  ;;  %v317_v22 = vsel %vm267_vm12, %v242_v18, %v292_v20  ;;  %vm268_vm13 = vcmp.ge.f32.partialorder %v243_v21, 0.0  ;;  %v1788_v29 = vadd.f32 %v1725_v44, %v1706_v27  ;;  %v719_v20 = vld [vmem:[#allocation5 + $0x158] sm:$0xff] }
 0x140   :  { %v1741_v56 = vadd.f32 %v228_v55, %v133_v28  ;;  %1165 = vmatprep.mubr.msk.f32.mxu1 %vm1601_vm0, %v1599_v0  ;;  %vm259_vm4 = vcmp.ge.f32.partialorder %v234_v53, 0.0  ;;  %v284_v57 = vmul.f32 0.2, %v234_v53  ;;  %v289_v11 = vmul.f32 0.2, %v239_v8 }
 0x141   :  { %vm264_vm9 = vcmp.ge.f32.partialorder %v239_v8, 0.0  ;;  %v244_v28 = vadd.f32 %v1729_v48, %v1764_v9  ;;  %v318_v31 = vsel %vm268_vm13, %v243_v21, %v293_v25  ;;  %v246_v38 = vadd.f32 %v1788_v29, %v1713_v32  ;;  %v718_v25 = vld [vmem:[#allocation5 + $0x150] sm:$0xff] }
 0x142   :  { %v309_v58 = vsel %vm259_vm4, %v234_v53, %v284_v57  ;;  %v235_v59 = vadd.f32 %v1741_v56, %v1711_v30  ;;  %v240_v12 = vadd.f32 %v1741_v56, %v1734_v50  ;;  %v314_v13 = vsel %vm264_vm9, %v239_v8, %v289_v11  ;;  %v711_v8 = vld [vmem:[#allocation5 + $0x118] sm:$0xff]  ;;  %v708_v11 = vld [vmem:[#allocation5 + $0x100] sm:$0xff] }
 0x143   :  { %1166 = vmatmul.mubr.f32.gmra.mrb[6].mxu1 %v309_v58  ;;  %v294_v33 = vmul.f32 0.2, %v244_v28  ;;  %v245_v34 = vadd.f32 %v1741_v56, %v1764_v9  ;;  %vm269_vm14 = vcmp.ge.f32.partialorder %v244_v28, 0.0  ;;  %v296_v39 = vmul.f32 0.2, %v246_v38 }
 0x144   :  { %1168 = vmatprep.mubr.msk.f32.mxu1 %vm1601_vm0, %v1599_v0  ;;  %vm260_vm5 = vcmp.ge.f32.partialorder %v235_v59, 0.0  ;;  %v285_v61 = vmul.f32 0.2, %v235_v59  ;;  %v290_v14 = vmul.f32 0.2, %v240_v12  ;;  %vm265_vm10 = vcmp.ge.f32.partialorder %v240_v12, 0.0 }
 0x145   :  { %v319_v35 = vsel %vm269_vm14, %v244_v28, %v294_v33  ;;  %v295_v37 = vmul.f32 0.2, %v245_v34  ;;  %vm270_vm15 = vcmp.ge.f32.partialorder %v245_v34, 0.0  ;;  %v247_v40 = vadd.f32 %v1788_v29, %v1717_v36  ;;  %v723_v33 = vld [vmem:[#allocation5 + $0x178] sm:$0xff] }
 0x146   :  { %v310_v62 = vsel %vm260_vm5, %v235_v59, %v285_v61  ;;  %v315_v16 = vsel %vm265_vm10, %v240_v12, %v290_v14  ;;  %vm271_vm1 = vcmp.ge.f32.partialorder %v246_v38, 0.0  ;;  %v248_v44 = vadd.f32 %v1788_v29, %v1721_v42  ;;  %v710_v12 = vld [vmem:[#allocation5 + $0x110] sm:$0xff]  ;;  %v715_v14 = vld [vmem:[#allocation5 + $0x138] sm:$0xff] }
 0x147   :  { %1169 = vmatmul.mubr.f32.gmra.mrb[8].mxu1 %v310_v62  ;;  %v320_v27 = vsel %vm270_vm15, %v245_v34, %v295_v37  ;;  %v321_v41 = vsel %vm271_vm1, %v246_v38, %v296_v39  ;;  %v297_v43 = vmul.f32 0.2, %v247_v40  ;;  %vm272_vm2 = vcmp.ge.f32.partialorder %v247_v40, 0.0  ;;  %v722_v37 = vld [vmem:[#allocation5 + $0x170] sm:$0xff]  ;;  %v727_v39 = vld [vmem:[#allocation5 + $0x198] sm:$0xff] }
 0x148   :  { %1171 = vmatprep.mubr.msk.f32.mxu1 %vm1601_vm0, %v1599_v0  ;;  %v298_v46 = vmul.f32 0.2, %v248_v44  ;;  %v249_v47 = vadd.f32 %v1729_v48, %v1788_v29  ;;  %vm273_vm3 = vcmp.ge.f32.partialorder %v248_v44, 0.0  ;;  %v250_v52 = vadd.f32 %v1741_v56, %v1788_v29 }
 0x149   :  { %v322_v45 = vsel %vm272_vm2, %v247_v40, %v297_v43  ;;  %v251_v57 = vadd.f32 %v1739_v54, %v1713_v32  ;;  %v252_v60 = vadd.f32 %v1739_v54, %v1717_v36  ;;  %v253_v32 = vadd.f32 %v1739_v54, %v1721_v42  ;;  %v726_v43 = vld [vmem:[#allocation5 + $0x190] sm:$0xff] }
 0x14a   :  { %v323_v49 = vsel %vm273_vm3, %v248_v44, %v298_v46  ;;  %v299_v51 = vmul.f32 0.2, %v249_v47  ;;  %vm274_vm4 = vcmp.ge.f32.partialorder %v249_v47, 0.0  ;;  %v300_v55 = vmul.f32 0.2, %v250_v52  ;;  %v731_v46 = vld [vmem:[#allocation5 + $0x1b8] sm:$0xff] }
 0x14b   :  { %1172 = vmatmul.mubr.f32.gmra.mrb[10].mxu1 %v311_v3  ;;  %vm275_vm5 = vcmp.ge.f32.partialorder %v250_v52, 0.0  ;;  %v301_v59 = vmul.f32 0.2, %v251_v57  ;;  %vm276_vm6 = vcmp.ge.f32.partialorder %v251_v57, 0.0  ;;  %v302_v62 = vmul.f32 0.2, %v252_v60 }
 0x14c   :  { %1174 = vmatprep.mubr.msk.f32.mxu1 %vm1601_vm0, %v1599_v0  ;;  %v324_v53 = vsel %vm274_vm4, %v249_v47, %v299_v51  ;;  %v325_v58 = vsel %vm275_vm5, %v250_v52, %v300_v55  ;;  %vm277_vm7 = vcmp.ge.f32.partialorder %v252_v60, 0.0  ;;  %v303_v2 = vmul.f32 0.2, %v253_v32  ;;  %v730_v51 = vld [vmem:[#allocation5 + $0x1b0] sm:$0xff]  ;;  %v735_v55 = vld [vmem:[#allocation5 + $0x1d8] sm:$0xff] }
 0x14d   :  { %v326_v61 = vsel %vm276_vm6, %v251_v57, %v301_v59  ;;  %v327_v63 = vsel %vm277_vm7, %v252_v60, %v302_v62  ;;  %v254_v36 = vadd.f32 %v1739_v54, %v1729_v48  ;;  %vm278_vm8 = vcmp.ge.f32.partialorder %v253_v32, 0.0  ;;  %v734_v59 = vld [vmem:[#allocation5 + $0x1d0] sm:$0xff]  ;;  %v737_v62 = vld [vmem:[#allocation5 + $0x1e8] sm:$0xff] }
 0x14e   :  { %v328_v3 = vsel %vm278_vm8, %v253_v32, %v303_v2  ;;  %v255_v42 = vadd.f32 %v1741_v56, %v1739_v54  ;;  %v1336_v56 = vpack.c.bf16 %v710_v12, %v708_v11  ;;  %v739_v32 = vld [vmem:[#allocation5 + $0x1f8] sm:$0xff] }
 0x14f   :  { %1175 = vmatmul.mubr.f32.gmra.mrb[12].mxu1 %v312_v6  ;;  %v304_v4 = vmul.f32 0.2, %v254_v36  ;;  %vm279_vm9 = vcmp.ge.f32.partialorder %v254_v36, 0.0 }
 0x150   :  { %1177 = vmatprep.mubr.msk.f32.mxu1 %vm1601_vm0, %v1599_v0  ;;  %v305_v6 = vmul.f32 0.2, %v255_v42  ;;  %vm280_vm10 = vcmp.ge.f32.partialorder %v255_v42, 0.0 }
 0x151   :  { %v329_v5 = vsel %vm279_vm9, %v254_v36, %v304_v4  ;;  %v1362_v36 = vpack.c.bf16 %v739_v32, %v737_v62 }
 0x152   :  { %v330_v48 = vsel %vm280_vm10, %v255_v42, %v305_v6 }
 0x153   :  { %1178 = vmatmul.mubr.f32.gmra.mrb[14].mxu1 %v313_v10  ;;  %v1334_v10 = vpack.c.bf16 %v711_v8, %v709_v7 }
 0x154   :  { %1180 = vmatprep.mubr.msk.f32.mxu1 %vm1601_vm0, %v1599_v0 }
 0x155   :  { %1335 = vmatprep.subr.bf16.mxu0 %v1334_v10 }
 0x156   :  { %1337 = vmatpush1.bf16.msra.mxu0 %v1336_v56 }
 0x157   :  { %1181 = vmatmul.mubr.f32.gmra.mrb[16].mxu1 %v314_v13  ;;  %v713_v13 = vld [vmem:[#allocation5 + $0x128] sm:$0xff] }
 0x158   :  { %1183 = vmatprep.mubr.msk.f32.mxu1 %vm1601_vm0, %v1599_v0  ;;  %v1338_v15 = vpack.c.bf16 %v715_v14, %v713_v13 }
 0x15a   :  { %1339 = vmatprep.subr.bf16.mxu0 %v1338_v15 }
 0x15b   :  { %1184 = vmatmul.mubr.f32.gmra.mrb[18].mxu1 %v315_v16  ;;  %v712_v16 = vld [vmem:[#allocation5 + $0x120] sm:$0xff] }
 0x15c   :  { %1186 = vmatprep.mubr.msk.f32.mxu1 %vm1601_vm0, %v1599_v0  ;;  %v1340_v18 = vpack.c.bf16 %v714_v17, %v712_v16 }
 0x15e   :  { %1341 = vmatpush1.bf16.msra.mxu0 %v1340_v18 }
 0x15f   :  { %1187 = vmatmul.mubr.f32.gmra.mrb[20].mxu1 %v316_v19  ;;  %v717_v19 = vld [vmem:[#allocation5 + $0x148] sm:$0xff] }
 0x160   :  { %1189 = vmatprep.mubr.msk.f32.mxu1 %vm1601_vm0, %v1599_v0  ;;  %v1342_v21 = vpack.c.bf16 %v719_v20, %v717_v19 }
 0x162   :  { %1343 = vmatprep.subr.bf16.mxu0 %v1342_v21 }
 0x163   :  { %1190 = vmatmul.mubr.f32.gmra.mrb[22].mxu1 %v317_v22  ;;  %v716_v22 = vld [vmem:[#allocation5 + $0x140] sm:$0xff] }
 0x164   :  { %1192 = vmatprep.mubr.msk.f32.mxu1 %vm1601_vm0, %v1599_v0  ;;  %v1344_v28 = vpack.c.bf16 %v718_v25, %v716_v22 }
 0x166   :  { %1345 = vmatpush1.bf16.msra.mxu0 %v1344_v28 }
 0x167   :  { %1193 = vmatmul.mubr.f32.gmra.mrb[24].mxu1 %v318_v31  ;;  %v721_v31 = vld [vmem:[#allocation5 + $0x168] sm:$0xff] }
 0x168   :  { %1195 = vmatprep.mubr.msk.f32.mxu1 %vm1601_vm0, %v1599_v0  ;;  %v1346_v34 = vpack.c.bf16 %v723_v33, %v721_v31 }
 0x16a   :  { %1347 = vmatprep.subr.bf16.mxu0 %v1346_v34 }
 0x16b   :  { %1196 = vmatmul.mubr.f32.gmra.mrb[26].mxu1 %v319_v35  ;;  %v720_v35 = vld [vmem:[#allocation5 + $0x160] sm:$0xff] }
 0x16c   :  { %1198 = vmatprep.mubr.msk.f32.mxu1 %vm1601_vm0, %v1599_v0  ;;  %v1348_v38 = vpack.c.bf16 %v722_v37, %v720_v35 }
 0x16e   :  { %1349 = vmatpush1.bf16.msra.mxu0 %v1348_v38 }
 0x16f   :  { %1199 = vmatmul.mubr.f32.gmra.mrb[28].mxu1 %v320_v27  ;;  %v725_v27 = vld [vmem:[#allocation5 + $0x188] sm:$0xff] }
 0x170   :  { %1201 = vmatprep.mubr.msk.f32.mxu1 %vm1601_vm0, %v1599_v0  ;;  %v1350_v40 = vpack.c.bf16 %v727_v39, %v725_v27 }
 0x172   :  { %1351 = vmatprep.subr.bf16.mxu0 %v1350_v40 }
 0x173   :  { %1202 = vmatmul.mubr.f32.gmra.mrb[30].mxu1 %v321_v41  ;;  %v724_v41 = vld [vmem:[#allocation5 + $0x180] sm:$0xff] }
 0x174   :  { %1204 = vmatprep.mubr.msk.f32.mxu1 %vm1601_vm0, %v1599_v0  ;;  %v1352_v44 = vpack.c.bf16 %v726_v43, %v724_v41 }
 0x176   :  { %1353 = vmatpush1.bf16.msra.mxu0 %v1352_v44 }
 0x177   :  { %1205 = vmatmul.mubr.f32.gmra.mrb[32].mxu1 %v322_v45  ;;  %v729_v45 = vld [vmem:[#allocation5 + $0x1a8] sm:$0xff] }
 0x178   :  { %1207 = vmatprep.mubr.msk.f32.mxu1 %vm1601_vm0, %v1599_v0  ;;  %v1354_v47 = vpack.c.bf16 %v731_v46, %v729_v45 }
 0x17a   :  { %1355 = vmatprep.subr.bf16.mxu0 %v1354_v47 }
 0x17b   :  { %1208 = vmatmul.mubr.f32.gmra.mrb[34].mxu1 %v323_v49  ;;  %v728_v49 = vld [vmem:[#allocation5 + $0x1a0] sm:$0xff] }
 0x17c   :  { %1210 = vmatprep.mubr.msk.f32.mxu1 %vm1601_vm0, %v1599_v0  ;;  %v1356_v52 = vpack.c.bf16 %v730_v51, %v728_v49 }
 0x17e   :  { %1357 = vmatpush1.bf16.msra.mxu0 %v1356_v52 }
 0x17f   :  { %1211 = vmatmul.mubr.f32.gmra.mrb[36].mxu1 %v324_v53  ;;  %v733_v53 = vld [vmem:[#allocation5 + $0x1c8] sm:$0xff] }
 0x180   :  { %1213 = vmatprep.mubr.msk.f32.mxu1 %vm1601_vm0, %v1599_v0  ;;  %v1358_v57 = vpack.c.bf16 %v735_v55, %v733_v53 }
 0x182   :  { %1359 = vmatprep.subr.bf16.mxu0 %v1358_v57 }
 0x183   :  { %1214 = vmatmul.mubr.f32.gmra.mrb[38].mxu1 %v325_v58  ;;  %v732_v58 = vld [vmem:[#allocation5 + $0x1c0] sm:$0xff] }
 0x184   :  { %1216 = vmatprep.mubr.msk.f32.mxu1 %vm1601_vm0, %v1599_v0  ;;  %v1360_v60 = vpack.c.bf16 %v734_v59, %v732_v58 }
 0x186   :  { %1361 = vmatpush1.bf16.msra.mxu0 %v1360_v60 }
 0x187   :  { %1217 = vmatmul.mubr.f32.gmra.mrb[40].mxu1 %v326_v61  ;;  %1363 = vmatprep.subr.bf16.mxu0 %v1362_v36 }
 0x188   :  { %1219 = vmatprep.mubr.msk.f32.mxu1 %vm1601_vm0, %v1599_v0 }
 0x18b   :  { %1220 = vmatmul.mubr.f32.gmra.mrb[42].mxu1 %v327_v63  ;;  %v736_v63 = vld [vmem:[#allocation5 + $0x1e0] sm:$0xff] }
 0x18c   :  { %1222 = vmatprep.mubr.msk.f32.mxu1 %vm1601_vm0, %v1599_v0 }
 0x18f   :  { %1223 = vmatmul.mubr.f32.gmra.mrb[44].mxu1 %v328_v3  ;;  %v738_v3 = vld [vmem:[#allocation5 + $0x1f0] sm:$0xff] }
 0x190   :  { %1225 = vmatprep.mubr.msk.f32.mxu1 %vm1601_vm0, %v1599_v0  ;;  %v1364_v4 = vpack.c.bf16 %v738_v3, %v736_v63 }
 0x192   :  { %1365 = vmatpush1.bf16.msra.mxu0 %v1364_v4 }
 0x193   :  { %1226 = vmatmul.mubr.f32.gmra.mrb[46].mxu1 %v329_v5  ;;  %1366 = vmatprep.subr.bf16.mxu0 %v1600_v1 }
 0x194   :  { %1228 = vmatprep.mubr.msk.f32.mxu1 %vm1601_vm0, %v1599_v0 }
 0x197   :  { %1229 = vmatmul.mubr.f32.gmra.mrb[48].mxu1 %v330_v48 }
 0x20a   :  { %v1836_v61 = vpop.f32.mrb[0].mxu1 }
 0x20b   :  { %v1158_v2 = vpop.f32.mrb[1].mxu1 }
 0x20e   :  { %v1838_v42 = vpop.f32.mrb[2].mxu1 }
 0x20f   :  { %v1161_v5 = vpop.f32.mrb[3].mxu1 }
 0x212   :  { %v1841_v6 = vpop.f32.mrb[4].mxu1 }
 0x213   :  { %v1164_v48 = vpop.f32.mrb[5].mxu1 }
 0x216   :  { %v1843_v7 = vpop.f32.mrb[6].mxu1 }
 0x217   :  { %v1167_v8 = vpop.f32.mrb[7].mxu1 }
 0x21a   :  { %v1845_v10 = vpop.f32.mrb[8].mxu1 }
 0x21b   :  { %v1170_v11 = vpop.f32.mrb[9].mxu1 }
 0x21e   :  { %v422_v12 = vpop.f32.mrb[10].mxu1 }
 0x21f   :  { %v521_v56 = vmax.f32 %v1836_v61, %v422_v12  ;;  %v1173_v13 = vpop.f32.mrb[11].mxu1 }
 0x222   :  { %v1848_v14 = vpop.f32.mrb[12].mxu1 }
 0x223   :  { %v525_v15 = vmax.f32 %v1838_v42, %v1848_v14  ;;  %v1176_v16 = vpop.f32.mrb[13].mxu1 }
 0x226   :  { %v1852_v17 = vpop.f32.mrb[14].mxu1 }
 0x227   :  { %v529_v18 = vmax.f32 %v1841_v6, %v1852_v17  ;;  %v1179_v19 = vpop.f32.mrb[15].mxu1 }
 0x22a   :  { %v1856_v20 = vpop.f32.mrb[16].mxu1 }
 0x22b   :  { %v533_v21 = vmax.f32 %v1843_v7, %v1856_v20  ;;  %v1182_v22 = vpop.f32.mrb[17].mxu1 }
 0x22e   :  { %v1860_v25 = vpop.f32.mrb[18].mxu1 }
 0x22f   :  { %v537_v28 = vmax.f32 %v1845_v10, %v1860_v25  ;;  %v1185_v31 = vpop.f32.mrb[19].mxu1 }
 0x232   :  { %v447_v33 = vpop.f32.mrb[20].mxu1 }
 0x233   :  { %v522_v34 = vmax.f32 %v521_v56, %v447_v33  ;;  %v1188_v35 = vpop.f32.mrb[21].mxu1 }
 0x236   :  { %v452_v37 = vpop.f32.mrb[22].mxu1 }
 0x237   :  { %v526_v38 = vmax.f32 %v525_v15, %v452_v37  ;;  %v1191_v27 = vpop.f32.mrb[23].mxu1 }
 0x23a   :  { %v1864_v39 = vpop.f32.mrb[24].mxu1 }
 0x23b   :  { %v530_v40 = vmax.f32 %v529_v18, %v1864_v39  ;;  %v1194_v41 = vpop.f32.mrb[25].mxu1 }
 0x23e   :  { %v1867_v43 = vpop.f32.mrb[26].mxu1 }
 0x23f   :  { %v1870_v44 = vmax.f32 %v533_v21, %v1867_v43  ;;  %v1197_v45 = vpop.f32.mrb[27].mxu1 }
 0x242   :  { %v1872_v46 = vpop.f32.mrb[28].mxu1 }
 0x243   :  { %v1875_v47 = vmax.f32 %v537_v28, %v1872_v46  ;;  %v1200_v49 = vpop.f32.mrb[29].mxu1 }
 0x246   :  { %v472_v51 = vpop.f32.mrb[30].mxu1 }
 0x247   :  { %v523_v52 = vmax.f32 %v522_v34, %v472_v51  ;;  %v1203_v53 = vpop.f32.mrb[31].mxu1 }
 0x24a   :  { %v477_v55 = vpop.f32.mrb[32].mxu1 }
 0x24b   :  { %v527_v57 = vmax.f32 %v526_v38, %v477_v55  ;;  %v1206_v58 = vpop.f32.mrb[33].mxu1 }
 0x24e   :  { %v482_v59 = vpop.f32.mrb[34].mxu1 }
 0x24f   :  { %v531_v60 = vmax.f32 %v530_v40, %v482_v59  ;;  %v1209_v62 = vpop.f32.mrb[35].mxu1 }
 0x252   :  { %v1877_v32 = vpop.f32.mrb[36].mxu1 }
 0x253   :  { %v535_v63 = vmax.f32 %v1870_v44, %v1877_v32  ;;  %v1212_v2 = vpop.f32.mrb[37].mxu1 }
 0x256   :  { %v1881_v36 = vpop.f32.mrb[38].mxu1 }
 0x257   :  { %v539_v3 = vmax.f32 %v1875_v47, %v1881_v36  ;;  %v1215_v4 = vpop.f32.mrb[39].mxu1 }
 0x25a   :  { %v497_v5 = vpop.f32.mrb[40].mxu1 }
 0x25b   :  { %v524_v48 = vmax.f32 %v523_v52, %v497_v5  ;;  %v1218_v8 = vpop.f32.mrb[41].mxu1 }
 0x25d   :  { %v541_v11 = vsub.f32 %v1836_v61, %v524_v48  ;;  %v546_v56 = vsub.f32 %v422_v12, %v524_v48  ;;  %v551_v13 = vsub.f32 %v447_v33, %v524_v48  ;;  %v556_v15 = vsub.f32 %v472_v51, %v524_v48 }
 0x25e   :  { %v561_v16 = vsub.f32 %v497_v5, %v524_v48  ;;  %v502_v18 = vpop.f32.mrb[42].mxu1 }
 0x25f   :  { %v566_v19 = vmul.f32 1.442695, %v541_v11  ;;  %v576_v21 = vmul.f32 1.442695, %v546_v56  ;;  %v586_v22 = vmul.f32 1.442695, %v551_v13  ;;  %v528_v28 = vmax.f32 %v527_v57, %v502_v18 }
 0x260   :  { %v596_v31 = vmul.f32 1.442695, %v556_v15  ;;  %v606_v34 = vmul.f32 1.442695, %v561_v16  ;;  %v1221_v35 = vpop.f32.mrb[43].mxu1 }
 0x261   :  { %1402 = vpow2.f32 %v566_v19  ;;  %v542_v38 = vsub.f32 %v1838_v42, %v528_v28  ;;  %v547_v27 = vsub.f32 %v1848_v14, %v528_v28  ;;  %v552_v40 = vsub.f32 %v452_v37, %v528_v28 }
 0x262   :  { %1404 = vpow2.f32 %v576_v21  ;;  %v557_v61 = vsub.f32 %v477_v55, %v528_v28  ;;  %v562_v12 = vsub.f32 %v502_v18, %v528_v28  ;;  %v507_v33 = vpop.f32.mrb[44].mxu1 }
 0x263   :  { %1406 = vpow2.f32 %v586_v22  ;;  %v568_v41 = vmul.f32 1.442695, %v542_v38  ;;  %v578_v44 = vmul.f32 1.442695, %v547_v27  ;;  %v588_v45 = vmul.f32 1.442695, %v552_v40 }
 0x264   :  { %1408 = vpow2.f32 %v596_v31  ;;  %v532_v49 = vmax.f32 %v531_v60, %v507_v33  ;;  %v1224_v51 = vpop.f32.mrb[45].mxu1  ;;  %v598_v52 = vmul.f32 1.442695, %v557_v61  ;;  %v608_v53 = vmul.f32 1.442695, %v562_v12 }
 0x265   :  { %1410 = vpow2.f32 %v606_v34 }
 0x266   :  { %1412 = vpow2.f32 %v568_v41  ;;  %v543_v42 = vsub.f32 %v1841_v6, %v532_v49  ;;  %v548_v14 = vsub.f32 %v1852_v17, %v532_v49  ;;  %v553_v37 = vsub.f32 %v1864_v39, %v532_v49  ;;  %v512_v55 = vpop.f32.mrb[46].mxu1 }
 0x267   :  { %1414 = vpow2.f32 %v578_v44  ;;  %v558_v57 = vsub.f32 %v482_v59, %v532_v49  ;;  %v563_v58 = vsub.f32 %v507_v33, %v532_v49  ;;  %v536_v62 = vmax.f32 %v535_v63, %v512_v55  ;;  %v1227_v2 = vpop.f32.mrb[47].mxu1 }
 0x268   :  { %1416 = vpow2.f32 %v588_v45  ;;  %v570_v4 = vmul.f32 1.442695, %v543_v42  ;;  %v580_v60 = vmul.f32 1.442695, %v548_v14  ;;  %v590_v5 = vmul.f32 1.442695, %v553_v37 }
 0x269   :  { %1418 = vpow2.f32 %v598_v52  ;;  %v600_v48 = vmul.f32 1.442695, %v558_v57  ;;  %v610_v8 = vmul.f32 1.442695, %v563_v58  ;;  %v544_v11 = vsub.f32 %v1843_v7, %v536_v62 }
 0x26a   :  { %1420 = vpow2.f32 %v608_v53  ;;  %v549_v6 = vsub.f32 %v1856_v20, %v536_v62  ;;  %v554_v17 = vsub.f32 %v1867_v43, %v536_v62  ;;  %v559_v39 = vsub.f32 %v1877_v32, %v536_v62  ;;  %v1895_v59 = vpop.f32.mrb[48].mxu1 }
 0x26b   :  { %v1403_v63 = vpop.eup %1402  ;;  %1422 = vpow2.f32 %v570_v4  ;;  %v564_v56 = vsub.f32 %v512_v55, %v536_v62  ;;  %v572_v13 = vmul.f32 1.442695, %v544_v11  ;;  %v540_v15 = vmax.f32 %v539_v3, %v1895_v59  ;;  %v1230_v16 = vpop.f32.mrb[49].mxu1 }
 0x26c   :  { %v1405_v7 = vpop.eup %1404  ;;  %v641_v18 = vmul.f32 %v1403_v63, %v1711_v30  ;;  %1424 = vpow2.f32 %v580_v60  ;;  %v582_v20 = vmul.f32 1.442695, %v549_v6  ;;  %v592_v43 = vmul.f32 1.442695, %v554_v17 }
 0x26d   :  { %v1407_v19 = vpop.eup %1406  ;;  %v616_v32 = vadd.f32 %v1405_v7, %v1403_v63  ;;  %v646_v21 = vmul.f32 %v1405_v7, %v1734_v50  ;;  %1426 = vpow2.f32 %v590_v5  ;;  %v602_v22 = vmul.f32 1.442695, %v559_v39 }
 0x26e   :  { %v1409_v28 = vpop.eup %1408  ;;  %v651_v31 = vmul.f32 %v1407_v19, %v1764_v9  ;;  %1428 = vpow2.f32 %v600_v48  ;;  %v612_v34 = vmul.f32 1.442695, %v564_v56  ;;  %v545_v47 = vsub.f32 %v1845_v10, %v540_v15 }
 0x26f   :  { %v1411_v3 = vpop.eup %1410  ;;  %v617_v35 = vadd.f32 %v1407_v19, %v616_v32  ;;  %v656_v38 = vmul.f32 %v1409_v28, %v1788_v29  ;;  %v666_v27 = vadd.f32 %v646_v21, %v641_v18  ;;  %1430 = vpow2.f32 %v610_v8 }
 0x270   :  { %v1413_v40 = vpop.eup %1412  ;;  %v661_v61 = vmul.f32 %v1411_v3, %v1739_v54  ;;  %1432 = vpow2.f32 %v572_v13  ;;  %v550_v12 = vsub.f32 %v1860_v25, %v540_v15  ;;  %v555_v33 = vsub.f32 %v1872_v46, %v540_v15 }
 0x271   :  { %v1415_v41 = vpop.eup %1414  ;;  %v618_v44 = vadd.f32 %v1409_v28, %v617_v35  ;;  %v667_v45 = vadd.f32 %v666_v27, %v651_v31  ;;  %1434 = vpow2.f32 %v582_v20  ;;  %v560_v10 = vsub.f32 %v1881_v36, %v540_v15 }
 0x272   :  { %v1417_v49 = vpop.eup %1416  ;;  %v620_v51 = vadd.f32 %v1415_v41, %v1413_v40  ;;  %1436 = vpow2.f32 %v592_v43  ;;  %v565_v52 = vsub.f32 %v1895_v59, %v540_v15  ;;  %v574_v53 = vmul.f32 1.442695, %v545_v47 }
 0x273   :  { %v1419_v42 = vpop.eup %1418  ;;  %v619_v14 = vadd.f32 %v1411_v3, %v618_v44  ;;  %v668_v37 = vadd.f32 %v667_v45, %v656_v38  ;;  %1438 = vpow2.f32 %v602_v22  ;;  %v584_v55 = vmul.f32 1.442695, %v550_v12  ;;  %v1926_v45 = vld [vmem:[%s2030_s4] ss:$0 sm:$0xff] }
 0x274   :  { %v1421_v25 = vpop.eup %1420  ;;  %v621_v57 = vadd.f32 %v1417_v49, %v620_v51  ;;  %1440 = vpow2.f32 %v612_v34  ;;  %v594_v46 = vmul.f32 1.442695, %v555_v33  ;;  %v604_v2 = vmul.f32 1.442695, %v560_v10 }
 0x275   :  { %v1423_v58 = vpop.eup %1422  ;;  %1442 = vrcp.f32 %v619_v14  ;;  %v669_v62 = vadd.f32 %v668_v37, %v661_v61  ;;  %v642_v36 = vmul.f32 %v1413_v40, %v1711_v30  ;;  %v647_v5 = vmul.f32 %v1415_v41, %v1734_v50  ;;  %v743_v37 = vld [vmem:[#allocation7 + $0x80] sm:$0xff] }
 0x276   :  { %v1425_v4 = vpop.eup %1424  ;;  %v622_v60 = vadd.f32 %v1419_v42, %v621_v57  ;;  %1444 = vpow2.f32 %v574_v53  ;;  %v614_v11 = vmul.f32 1.442695, %v565_v52  ;;  %v652_v6 = vmul.f32 %v1417_v49, %v1764_v9 }
 0x277   :  { %v1427_v48 = vpop.eup %1426  ;;  %v624_v8 = vadd.f32 %v1425_v4, %v1423_v58  ;;  %1446 = vpow2.f32 %v584_v55  ;;  %v670_v59 = vadd.f32 %v647_v5, %v642_v36  ;;  %v643_v63 = vmul.f32 %v1423_v58, %v1711_v30  ;;  %v744_v55 = vld [vmem:[#allocation7 + $0x88] sm:$0xff] }
 0x278   :  { %v1429_v17 = vpop.eup %1428  ;;  %v623_v39 = vadd.f32 %v1421_v25, %v622_v60  ;;  %1448 = vpow2.f32 %v594_v46  ;;  %v648_v15 = vmul.f32 %v1425_v4, %v1734_v50  ;;  %v657_v7 = vmul.f32 %v1419_v42, %v1788_v29 }
 0x279   :  { %v1431_v56 = vpop.eup %1430  ;;  %v625_v13 = vadd.f32 %v1427_v48, %v624_v8  ;;  %1450 = vpow2.f32 %v604_v2  ;;  %v662_v18 = vmul.f32 %v1421_v25, %v1739_v54  ;;  %v671_v20 = vadd.f32 %v670_v59, %v652_v6 }
 0x27a   :  { %v1433_v16 = vpop.eup %1432  ;;  %1452 = vrcp.f32 %v623_v39  ;;  %v653_v32 = vmul.f32 %v1427_v48, %v1764_v9  ;;  %v674_v21 = vadd.f32 %v648_v15, %v643_v63  ;;  %v658_v38 = vmul.f32 %v1429_v17, %v1788_v29 }
 0x27b   :  { %v1435_v43 = vpop.eup %1434  ;;  %v626_v19 = vadd.f32 %v1429_v17, %v625_v13  ;;  %v644_v22 = vmul.f32 %v1433_v16, %v1711_v30  ;;  %1454 = vpow2.f32 %v614_v11  ;;  %v672_v34 = vadd.f32 %v671_v20, %v657_v7  ;;  %v746_v13 = vld [vmem:[#allocation7 + $0x98] sm:$0xff] }
 0x27c   :  { %v1437_v28 = vpop.eup %1436  ;;  %v628_v31 = vadd.f32 %v1435_v43, %v1433_v16  ;;  %v649_v47 = vmul.f32 %v1435_v43, %v1734_v50  ;;  %v675_v27 = vadd.f32 %v674_v21, %v653_v32  ;;  %v663_v10 = vmul.f32 %v1431_v56, %v1739_v54 }
 0x27d   :  { %v1439_v3 = vpop.eup %1438  ;;  %v627_v35 = vadd.f32 %v1431_v56, %v626_v19  ;;  %v673_v12 = vadd.f32 %v672_v34, %v662_v18  ;;  %v654_v33 = vmul.f32 %v1437_v28, %v1764_v9  ;;  %v1367_v8 = vpack.c.bf16 %v744_v55, %v743_v37  ;;  %v756_v37 = vld [vmem:[#allocation7 + $0xe8] sm:$0xff]  ;;  %v757_v55 = vld [vmem:[#allocation7 + $0xf0] sm:$0xff] }
 0x27e   :  { %v1441_v40 = vpop.eup %1440  ;;  %v629_v61 = vadd.f32 %v1437_v28, %v628_v31  ;;  %v678_v41 = vadd.f32 %v649_v47, %v644_v22  ;;  %v676_v49 = vadd.f32 %v675_v27, %v658_v38  ;;  %v659_v42 = vmul.f32 %v1439_v3, %v1788_v29 }
 0x27f   :  { %v1443_v44 = vpop.eup %1442  ;;  %1456 = vrcp.f32 %v627_v35  ;;  %v664_v46 = vmul.f32 %v1441_v40, %v1739_v54 }
 0x280   :  { %v1445_v51 = vpop.eup %1444  ;;  %v630_v52 = vadd.f32 %v1439_v3, %v629_v61  ;;  %v686_v53 = vmul.f32 %v1443_v44, %v669_v62  ;;  %v679_v14 = vadd.f32 %v678_v41, %v654_v33  ;;  %v677_v57 = vadd.f32 %v676_v49, %v663_v10  ;;  %v747_v61 = vld [vmem:[#allocation7 + $0xa0] sm:$0xff]  ;;  %v749_v41 = vld [vmem:[#allocation7 + $0xb0] sm:$0xff]  ;;  %v750_v44 = vld [vmem:[#allocation7 + $0xb8] sm:$0xff] }
 0x281   :  { %v1447_v25 = vpop.eup %1446  ;;  %v645_v58 = vmul.f32 %v1445_v51, %v1711_v30  ;;  %v745_v30 = vld [vmem:[#allocation7 + $0x90] sm:$0xff]  ;;  %v1376_v10 = vpack.c.bf16 %v750_v44, %v749_v41  ;;  %v751_v49 = vld [vmem:[#allocation7 + $0xc0] sm:$0xff] }
 0x282   :  { %v1449_v2 = vpop.eup %1448  ;;  %v631_v36 = vadd.f32 %v1441_v40, %v630_v52  ;;  %v632_v4 = vadd.f32 %v1447_v25, %v1445_v51  ;;  %v697_v60 = vadd.f32 %v1926_v45, %v686_v53  ;;  %v680_v5 = vadd.f32 %v679_v14, %v659_v42  ;;  %v752_v51 = vld [vmem:[#allocation7 + $0xc8] sm:$0xff]  ;;  %v753_v52 = vld [vmem:[#allocation7 + $0xd0] sm:$0xff]  ;;  %v754_v53 = vld [vmem:[#allocation7 + $0xd8] sm:$0xff] }
 0x283   :  { %v1451_v48 = vpop.eup %1450  ;;  %v650_v62 = vmul.f32 %v1447_v25, %v1734_v50  ;;  %v655_v63 = vmul.f32 %v1449_v2, %v1764_v9  ;;  %v1370_v43 = vpack.c.bf16 %v746_v13, %v745_v30  ;;  %v1382_v42 = vpack.c.bf16 %v754_v53, %v753_v52  ;;  %v755_v14 = vld [vmem:[#allocation7 + $0xe0] sm:$0xff] }
 0x284   :  { %v1453_v11 = vpop.eup %1452  ;;  %1458 = vrcp.f32 %v631_v36  ;;  %v633_v6 = vadd.f32 %v1449_v2, %v632_v4  ;;  %v702_v17 = vmax.f32 %v697_v60, 0.0  ;;  %v681_v39 = vadd.f32 %v680_v5, %v664_v46 }
 0x285   :  { %v687_v59 = vmul.f32 %v1453_v11, %v673_v12  ;;  %v682_v56 = vadd.f32 %v650_v62, %v645_v58  ;;  %v1455_v15 = vpop.eup %1454  ;;  %v660_v50 = vmul.f32 %v1451_v48, %v1788_v29  ;;  %v748_v12 = vld [vmem:[#allocation7 + $0xa8] sm:$0xff]  ;;  %v1385_v25 = vpack.c.bf16 %v756_v37, %v755_v14  ;;  %v1059_v62 = vld [vmem:[%s2028_s2 + $0x2] sm:$0x3]  ;;  %s1602_s2 = smov [#allocation9]  }
 0x286   :  { %v634_v16 = vadd.f32 %v1451_v48, %v633_v6  ;;  %837 = vmatmul.mubr.f32.vlgmr.msra.gmra.mrb[10].mxu0 %v702_v17  ;;  %v665_v32 = vmul.f32 %v1455_v15, %v1739_v54  ;;  %v1373_v33 = vpack.c.bf16 %v748_v12, %v747_v61  ;;  %v765_v11 = vrot.slane %v1059_v62, %v128_v24  ;;  %s1041_s16 = sshll.u32 %s1602_s2, 4  ;;  %s1042_s16 = int_to_ptr.vmem [resolvable:$true] %s1041_s16 }
 0x287   :  { %841 = vmatprep.mubr.f32.mxu0 %v1599_v0  ;;  %v698_v7 = vadd.f32 %v1926_v45, %v687_v59  ;;  %v683_v18 = vadd.f32 %v682_v56, %v655_v63  ;;  %1368 = vmatpush3.bf16.msra.mxu0 %v1367_v8  ;;  %v769_v6 = vrot.slane %v1059_v62, %v132_v26  ;;  %s1540_s22 = scalar_lea.vmem %s1042_s16, 640  ;;  %p1545_p11 = scmp.lt.s32.totalorder %s1042_s16, %s1042_s16 }
 0x288   :  { %v635_v20 = vadd.f32 %v1455_v15, %v634_v16  ;;  %1369 = vmatprep.subr.bf16.mxu0 %v1600_v1  ;;  %p1541_p10 = scmp.ne.s32.totalorder %s1042_s16, %s1540_s22  ;;  %p1546_p12 = scmp.lt.s32.totalorder %s1540_s22, %s1540_s22 }
 0x289   :  { %v1457_v19 = vpop.eup %1456  ;;  %v703_v9 = vmax.f32 %v698_v7, 0.0  ;;  %v684_v21 = vadd.f32 %v683_v18, %v660_v50 }
 0x28a   :  { %1460 = vrcp.f32 %v635_v20  ;;  %v688_v22 = vmul.f32 %v1457_v19, %v677_v57  ;;  %v758_v57 = vld [vmem:[#allocation7 + $0xf8] sm:$0xff]  ;;  %p1547_p13 = por %p1546_p12, %p1545_p11 }
 0x28b   :  { %842 = vmatmul.mubr.f32.gmra.mrb[12].mxu0 %v703_v9  ;;  %v685_v28 = vadd.f32 %v684_v21, %v665_v32  ;;  %v1388_v46 = vpack.c.bf16 %v758_v57, %v757_v55 }
 0x28c   :  { %846 = vmatprep.mubr.f32.mxu0 %v1599_v0  ;;  %v699_v31 = vadd.f32 %v1926_v45, %v688_v22  ;;  %1371 = vmatpush3.bf16.msra.mxu0 %v1370_v43  ;;  %p1548_p0 = pnand %p1547_p13, %p1541_p10 }
 0x28d   :  { %1372 = vmatprep.subr.bf16.mxu0 %v1600_v1 }
 0x28e   :  { %v1459_v29 = vpop.eup %1458  ;;  %v704_v34 = vmax.f32 %v699_v31, 0.0 }
 0x28f   :  { %v689_v47 = vmul.f32 %v1459_v29, %v681_v39 }
 0x290   :  { %847 = vmatmul.mubr.f32.gmra.mrb[14].mxu0 %v704_v34 }
 0x291   :  { %851 = vmatprep.mubr.f32.mxu0 %v1599_v0  ;;  %v700_v54 = vadd.f32 %v1926_v45, %v689_v47  ;;  %1374 = vmatpush3.bf16.msra.mxu0 %v1373_v33 }
 0x292   :  { %1375 = vmatprep.subr.bf16.mxu0 %v1600_v1 }
 0x293   :  { %v705_v3 = vmax.f32 %v700_v54, 0.0 }
 0x294   :  { %v1461_v35 = vpop.eup %1460 }
 0x295   :  { %852 = vmatmul.mubr.f32.gmra.mrb[16].mxu0 %v705_v3  ;;  %v690_v38 = vmul.f32 %v1461_v35, %v685_v28 }
 0x296   :  { %856 = vmatprep.mubr.f32.mxu0 %v1599_v0  ;;  %1377 = vmatpush3.bf16.msra.mxu0 %v1376_v10 }
 0x297   :  { %v701_v27 = vadd.f32 %v1926_v45, %v690_v38  ;;  %1378 = vmatprep.subr.bf16.mxu0 %v1600_v1  ;;  %v1379_v45 = vpack.c.bf16 %v752_v51, %v751_v49 }
 0x299   :  { %v706_v40 = vmax.f32 %v701_v27, 0.0 }
 0x29a   :  { %1380 = vmatpush3.bf16.msra.mxu0 %v1379_v45 }
 0x29b   :  { %857 = vmatmul.mubr.f32.gmra.mrb[18].mxu0 %v706_v40  ;;  %1381 = vmatprep.subr.bf16.mxu0 %v1600_v1 }
 0x29c   :  { %1263 = vmatprep.mubr.msk.f32.mxu0 %vm1601_vm0, %v1599_v0 }
 0x29e   :  { %1383 = vmatpush3.bf16.msra.mxu0 %v1382_v42 }
 0x29f   :  { %1384 = vmatprep.subr.bf16.mxu0 %v1600_v1 }
 0x2a2   :  { %1386 = vmatpush3.bf16.msra.mxu0 %v1385_v25 }
 0x2a3   :  { %1387 = vmatprep.subr.bf16.mxu0 %v1600_v1 }
 0x2a6   :  { %1389 = vmatpush3.bf16.msra.mxu0 %v1388_v46 }
 0x359   :  { %v838_v58 = vpop.f32.mrb[10].mxu0 }
 0x35a   :  { %v840_v2 = vpop.f32.mrb[11].mxu0  ;;  %v1961_v39 = vadd.f32 %v838_v58, %v765_v11 }
 0x35e   :  { %v843_v36 = vpop.f32.mrb[12].mxu0 }
 0x35f   :  { %v845_v4 = vpop.f32.mrb[13].mxu0  ;;  %v1963_v59 = vadd.f32 %v843_v36, %v765_v11 }
 0x363   :  { %v848_v60 = vpop.f32.mrb[14].mxu0 }
 0x364   :  { %v850_v5 = vpop.f32.mrb[15].mxu0  ;;  %v1967_v13 = vadd.f32 %v848_v60, %v765_v11 }
 0x368   :  { %v853_v48 = vpop.f32.mrb[16].mxu0 }
 0x369   :  { %v855_v8 = vpop.f32.mrb[17].mxu0  ;;  %v1970_v26 = vadd.f32 %v853_v48, %v765_v11 }
 0x36e   :  { %v858_v1 = vpop.f32.mrb[18].mxu0 }
 0x36f   :  { %v860_v17 = vpop.f32.mrb[19].mxu0  ;;  %v1974_v7 = vadd.f32 %v858_v1, %v765_v11 }
 0x370   :  { %v861_v63 = vadd.f32 %v860_v17, %v769_v6 }
 0x372   :  { %v863_v56 = vadd.f32 %v861_v63, %v1961_v39  ;;  %v864_v30 = vadd.f32 %v861_v63, %v1963_v59  ;;  %v865_v23 = vadd.f32 %v861_v63, %v1967_v13  ;;  %v866_v20 = vadd.f32 %v861_v63, %v1970_v26 }
 0x373   :  { %v867_v9 = vadd.f32 %v861_v63, %v1974_v7 }
 0x374   :  { %vm868_vm11 = vcmp.ge.f32.partialorder %v863_v56, 0.0  ;;  %v873_v15 = vmul.f32 0.2, %v863_v56  ;;  %v874_v24 = vmul.f32 0.2, %v864_v30  ;;  %vm869_vm12 = vcmp.ge.f32.partialorder %v864_v30, 0.0 }
 0x375   :  { %v875_v18 = vmul.f32 0.2, %v865_v23  ;;  %vm870_vm13 = vcmp.ge.f32.partialorder %v865_v23, 0.0  ;;  %v876_v19 = vmul.f32 0.2, %v866_v20  ;;  %vm871_vm14 = vcmp.ge.f32.partialorder %v866_v20, 0.0 }
 0x376   :  { %v878_v16 = vsel %vm868_vm11, %v863_v56, %v873_v15  ;;  %v879_v50 = vsel %vm869_vm12, %v864_v30, %v874_v24  ;;  %v877_v21 = vmul.f32 0.2, %v867_v9  ;;  %vm872_vm15 = vcmp.ge.f32.partialorder %v867_v9, 0.0 }
 0x377   :  { %1264 = vmatmul.mubr.f32.vlgmr.msra.gmra.mrb[20].mxu0 %v878_v16  ;;  %v880_v43 = vsel %vm870_vm13, %v865_v23, %v875_v18  ;;  %v881_v32 = vsel %vm871_vm14, %v866_v20, %v876_v19 }
 0x378   :  { %1266 = vmatprep.mubr.msk.f32.mxu0 %vm1601_vm0, %v1599_v0  ;;  %v882_v22 = vsel %vm872_vm15, %v867_v9, %v877_v21 }
 0x37b   :  { %1267 = vmatmul.mubr.f32.gmra.mrb[22].mxu0 %v879_v50 }
 0x37c   :  { %1269 = vmatprep.mubr.msk.f32.mxu0 %vm1601_vm0, %v1599_v0 }
 0x37f   :  { %1270 = vmatmul.mubr.f32.gmra.mrb[24].mxu0 %v880_v43 }
 0x380   :  { %1272 = vmatprep.mubr.msk.f32.mxu0 %vm1601_vm0, %v1599_v0 }
 0x383   :  { %1273 = vmatmul.mubr.f32.gmra.mrb[26].mxu0 %v881_v32 }
 0x384   :  { %1275 = vmatprep.mubr.msk.f32.mxu0 %vm1601_vm0, %v1599_v0 }
 0x387   :  { %1276 = vmatmul.mubr.f32.gmra.mrb[28].mxu0 %v882_v22 }
 0x44a   :  { %v949_v28 = vpop.f32.mrb[20].mxu0 }
 0x44b   :  { %v1265_v31 = vpop.f32.mrb[21].mxu0 }
 0x44e   :  { %v954_v29 = vpop.f32.mrb[22].mxu0 }
 0x44f   :  { %v1268_v34 = vpop.f32.mrb[23].mxu0 }
 0x452   :  { %v959_v47 = vpop.f32.mrb[24].mxu0 }
 0x453   :  { %v1271_v54 = vpop.f32.mrb[25].mxu0 }
 0x456   :  { %v964_v3 = vpop.f32.mrb[26].mxu0 }
 0x457   :  { %v975_v35 = vmax.f32 %v959_v47, %v964_v3  ;;  %v1274_v38 = vpop.f32.mrb[27].mxu0 }
 0x45a   :  { %v969_v27 = vpop.f32.mrb[28].mxu0 }
 0x45b   :  { %v973_v40 = vmax.f32 %v949_v28, %v969_v27  ;;  %v1277_v61 = vpop.f32.mrb[29].mxu0 }
 0x45d   :  { %v974_v12 = vmax.f32 %v973_v40, %v954_v29 }
 0x45f   :  { %v976_v33 = vmax.f32 %v974_v12, %v975_v35 }
 0x461   :  { %v977_v41 = vsub.f32 %v949_v28, %v976_v33  ;;  %v978_v44 = vsub.f32 %v954_v29, %v976_v33  ;;  %v979_v10 = vsub.f32 %v959_v47, %v976_v33  ;;  %v980_v0 = vsub.f32 %v964_v3, %v976_v33 }
 0x462   :  { %v981_v49 = vsub.f32 %v969_v27, %v976_v33 }
 0x463   :  { %v982_v51 = vmul.f32 1.442695, %v977_v41  ;;  %v984_v45 = vmul.f32 1.442695, %v978_v44  ;;  %v986_v52 = vmul.f32 1.442695, %v979_v10 }
 0x464   :  { %v988_v53 = vmul.f32 1.442695, %v980_v0  ;;  %v990_v42 = vmul.f32 1.442695, %v981_v49 }
 0x465   :  { %1462 = vpow2.f32 %v982_v51 }
 0x466   :  { %1464 = vpow2.f32 %v984_v45 }
 0x467   :  { %1466 = vpow2.f32 %v986_v52 }
 0x468   :  { %1468 = vpow2.f32 %v988_v53 }
 0x469   :  { %1470 = vpow2.f32 %v990_v42 }
 0x46f   :  { %v1463_v14 = vpop.eup %1462 }
 0x470   :  { %v1465_v37 = vpop.eup %1464  ;;  %v997_v55 = vmul.f32 %v1463_v14, %v1961_v39  ;;  %v1061_v39 = vld [vmem:[%s2030_s4 + $0x1] ss:$0 sm:$0xff] }
 0x471   :  { %v1467_v25 = vpop.eup %1466  ;;  %v992_v57 = vadd.f32 %v1465_v37, %v1463_v14  ;;  %v998_v46 = vmul.f32 %v1465_v37, %v1963_v59 }
 0x472   :  { %v1469_v58 = vpop.eup %1468  ;;  %v999_v36 = vmul.f32 %v1467_v25, %v1967_v13 }
 0x473   :  { %v993_v2 = vadd.f32 %v1467_v25, %v992_v57  ;;  %v1002_v4 = vadd.f32 %v998_v46, %v997_v55  ;;  %v1471_v60 = vpop.eup %1470  ;;  %v1000_v48 = vmul.f32 %v1469_v58, %v1970_v26 }
 0x474   :  { %v1001_v11 = vmul.f32 %v1471_v60, %v1974_v7 }
 0x475   :  { %v994_v5 = vadd.f32 %v1469_v58, %v993_v2  ;;  %v1003_v62 = vadd.f32 %v1002_v4, %v999_v36 }
 0x477   :  { %v995_v8 = vadd.f32 %v1471_v60, %v994_v5  ;;  %v1004_v6 = vadd.f32 %v1003_v62, %v1000_v48 }
 0x479   :  { %1472 = vrcp.f32 %v995_v8  ;;  %v1005_v1 = vadd.f32 %v1004_v6, %v1001_v11 }
 0x483   :  { %v1473_v17 = vpop.eup %1472 }
 0x484   :  { %v1006_v59 = vmul.f32 %v1473_v17, %v1005_v1  ;;  %v1016_v63 = vmul.f32 %v1473_v17, %v1463_v14  ;;  %v1017_v56 = vmul.f32 %v1473_v17, %v1465_v37  ;;  %v1018_v30 = vmul.f32 %v1473_v17, %v1467_v25 }
 0x485   :  { %v1019_v13 = vmul.f32 %v1473_v17, %v1469_v58  ;;  %v1020_v15 = vmul.f32 %v1473_v17, %v1471_v60 }
 0x486   :  { %v1013_v16 = vadd.f32 %v1061_v39, %v1006_v59  ;;  %1021 = vst [vmem:[#allocation9] sm:$0xff] %v1016_v63  ;;  %1022 = vst [vmem:[#allocation9 + $0x8] sm:$0xff] %v1017_v56 }
 0x487   :  { %1023 = vst [vmem:[#allocation9 + $0x10] sm:$0xff] %v1018_v30  ;;  %1024 = vst [vmem:[#allocation9 + $0x18] sm:$0xff] %v1019_v13 }
 0x488   :  { %1025 = vst [vmem:[#allocation9 + $0x20] sm:$0xff] %v1020_v15  ;;  %v1014_v24 = vmax.f32 %v1013_v16, 0.0 }
 0x489   :  { %1551 = shalt.err (!%p1548_p0)
}
 0x48a   :  { %s1552_s24 = scalar_lea.hbm %s2032_s6, 640 }
 0x48b   :  { %p1553_p1 = scmp.ne.s32.totalorder %s2032_s6, %s1552_s24  ;;  %p1556_p2 = scmp.lt.u32.totalorder %s1552_s24, %s2032_s6 }
 0x48d   :  { %p1558_p3 = pnand %p1556_p2, %p1553_p1 }
 0x48f   :  { %1561 = shalt.err (!%p1558_p3)
}
 0x490   :  { %1047 = dma.vmem_to_hbm [thread:$0]  %s1042_s16, 640, %s2032_s6, [#allocation10], %s1596_s1, %s1596_s1, %s1597_s21   ;;  %1015 = vst [vmem:[#allocation8] sm:$0xff] %v1014_v24 }
 0x491   :  { %s1562_s7 = scalar_lea.vmem %s1992_s20, 128  ;;  %p1567_p5 = scmp.lt.s32.totalorder %s1992_s20, %s1992_s20 }
 0x492   :  { %p1563_p4 = scmp.ne.s32.totalorder %s1992_s20, %s1562_s7  ;;  %p1568_p6 = scmp.lt.s32.totalorder %s1562_s7, %s1562_s7 }
 0x494   :  { %p1569_p7 = por %p1568_p6, %p1567_p5 }
 0x496   :  { %p1570_p8 = pnand %p1569_p7, %p1563_p4 }
 0x498   :  { %1573 = shalt.err (!%p1570_p8)
}
 0x499   :  { %s1574_s0 = scalar_lea.hbm %s2031_s5, 128 }
 0x49a   :  { %p1575_p9 = scmp.ne.s32.totalorder %s2031_s5, %s1574_s0  ;;  %p1578_p10 = scmp.lt.u32.totalorder %s1574_s0, %s2031_s5 }
 0x49c   :  { %p1580_p11 = pnand %p1578_p10, %p1575_p9 }
 0x49e   :  { %1583 = shalt.err (!%p1580_p11)
}
 0x49f   :  { %1035 = dma.vmem_to_hbm [thread:$0]  %s1992_s20, 128, %s2031_s5, [#allocation4]  }
 0x4a0   :  { %1588 = dma.done.wait [#allocation4], 128  }
 0x4a1   :  { %1589 = vsyncadd [#allocation4], 4294967168 }
 0x4a2   :  { %1590 = dma.done.wait [#allocation10], 640  }
 0x4a3   :  { %1591 = vsyncadd [#allocation10], 4294966656 }
 0x4a4   :  { %1054 = vsyncpa [#allocation3], 1 }
 0x4a5   :  { %1055 = vsyncpa [#allocation6], 1 }
 0x4a6   :  { %1056 = vsyncpa [#allocation4], 1 }
 0x4a7   :  { %1057 = vsyncpa [#allocation10], 1 }

</bundles_post_ra>
